<compile_context>
chip_gen: v7x
topology: tpu7x:2x2x1
jax: 0.10.0
libtpu: 0.0.40
codegen_flags: <defaults>
</compile_context>

<pallas_src>
import numpy as np

import jax
import jax.numpy as jnp
from jax import lax
from jax.experimental import pallas as pl
from jax.experimental.pallas import tpu as pltpu

EPS = 1e-5


def _tap_masks(N, H, W):
    """(9, N*H*W) f32 0/1 masks for the 3x3 / pad=1 taps, tap order kh*3+kw."""
    hh, ww = np.meshgrid(np.arange(H), np.arange(W), indexing="ij")
    masks = []
    for kh in range(3):
        for kw in range(3):
            dh, dw = kh - 1, kw - 1
            m = ((hh + dh >= 0) & (hh + dh < H) & (ww + dw >= 0) & (ww + dw < W))
            masks.append(np.tile(m[None], (N, 1, 1)).reshape(-1))
    return np.stack(masks, 0).astype(np.float32)


def _make_conv_block_kernel(N, H, W, Cin, C):
    P = N * H * W
    inv_p = 1.0 / float(P)
    # flat-pixel offset of tap (kh, kw); shift chosen so that
    # pltpu.roll(act, shift, axis=1)[:, p] == act[:, p + off]  (jnp.roll semantics)
    tap_shifts = [(-((kh - 1) * W + (kw - 1))) % P
                  for kh in range(3) for kw in range(3)]

    def kernel(x_ref, masks_ref, w0_ref, w1_ref, wd_ref, w2_ref, bn_ref, out_ref):
        masks = [masks_ref[t:t + 1, :] for t in range(9)]          # (1, P) each

        def shifted(act, t):
            """act[:, p + off_t] at lane p; halo (wrapped) lanes zeroed by mask."""
            if tap_shifts[t] == 0:                                  # centre tap
                return act
            return pltpu.roll(act, tap_shifts[t], axis=1) * masks[t]

        def im2col(act):
            """(Cc, P) f32 -> (9*Cc, P) bf16 stack of zero-padded 3x3 taps."""
            return jnp.concatenate([shifted(act, t) for t in range(9)],
                                   axis=0).astype(jnp.bfloat16)

        def bn_relu(acc, col):
            """Train-mode BatchNorm (batch stats) folded to scale/shift, then ReLU."""
            gamma = bn_ref[:, col:col + 1]
            beta = bn_ref[:, col + 1:col + 2]
            s = jnp.sum(acc, axis=1, keepdims=True)
            ss = jnp.sum(acc * acc, axis=1, keepdims=True)
            mean = s * inv_p
            var = jnp.maximum(ss * inv_p - mean * mean, 0.0)
            scale = gamma * lax.rsqrt(var + EPS)
            shift = beta - mean * scale
            return jnp.maximum(acc * scale + shift, 0.0)

        # stage 0: conv3x3 (Cin -> C) + BN + ReLU (conv bias cancelled by BN)
        y0 = bn_relu(jnp.dot(w0_ref[...], im2col(x_ref[...]),
                             preferred_element_type=jnp.float32), 0)
        # stage 1: ghost primary conv3x3 (C -> C) + BN + ReLU
        x1 = bn_relu(jnp.dot(w1_ref[...], im2col(y0),
                             preferred_element_type=jnp.float32), 2)
        # stage 2: ghost cheap op, depthwise conv3x3 + BN + ReLU (VPU, f32)
        acc = x1 * wd_ref[:, 4:5]                                   # centre tap
        for t in range(9):
            if t == 4:
                continue
            acc = acc + shifted(x1, t) * wd_ref[:, t:t + 1]
        x2 = bn_relu(acc, 4)
        # stage 3: conv1x1 on concat([x1, x2]) + BN + ReLU; concat never materialized
        acc3 = jnp.dot(w2_ref[:, :C], x1.astype(jnp.bfloat16),
                       preferred_element_type=jnp.float32)
        acc3 = acc3 + jnp.dot(w2_ref[:, C:], x2.astype(jnp.bfloat16),
                              preferred_element_type=jnp.float32)
        out_ref[...] = bn_relu(acc3, 6)

    return kernel


@jax.jit
def conv_block_pallas(x_nchw, params):
    """x_nchw: (N, in_ch, H, W) f32 -> (N, out_ch, H, W) f32 (conv_block.forward)."""
    N, Cin, H, W = x_nchw.shape
    C = params["w0"].shape[0]
    P = N * H * W

    # channels-major, flat-pixel layouts (pixel axis -> lanes)
    x_flat = jnp.transpose(x_nchw, (1, 0, 2, 3)).reshape(Cin, P)
    masks = jnp.asarray(_tap_masks(N, H, W))                        # (9, P)
    # conv weights packed for K=9*C_in im2col matmuls (tap-major, channel-minor), bf16
    w0m = jnp.transpose(params["w0"], (0, 2, 3, 1)).reshape(C, 9 * Cin).astype(jnp.bfloat16)
    w1m = jnp.transpose(params["w1"], (0, 2, 3, 1)).reshape(C, 9 * C).astype(jnp.bfloat16)
    wdm = params["wd"].reshape(C, 9).astype(jnp.float32)            # depthwise, f32 VPU
    w2m = params["w2"].reshape(C, 2 * C).astype(jnp.bfloat16)       # 1x1 conv
    # all BN affine params in one (C, 8) block: [g0 be0 g1 be1 g2 be2 g3 be3]
    bn = jnp.stack([params["g0"], params["be0"], params["g1"], params["be1"],
                    params["g2"], params["be2"], params["g3"], params["be3"]],
                   axis=1).astype(jnp.float32)
    # NOTE: conv biases b0/b1/bd/b2 are intentionally not passed -- a per-channel bias
    # immediately before batch-statistics BN is exactly cancelled by the mean subtraction.

    full = lambda s: pl.BlockSpec(s, lambda i: (0,) * len(s))

    # TODO(synk): for production shapes, tile the pixel axis over a real grid with a
    # two-phase (sum / sum-of-squares) BatchNorm reduction so the working set fits
    # v7x's 64 MiB VMEM and the tiled axis can be marked "parallel" for both
    # TensorCores; at these demo shapes one fused grid step is smallest and fastest.
    out_flat = pl.pallas_call(
        _make_conv_block_kernel(N, H, W, Cin, C),
        out_shape=jax.ShapeDtypeStruct((C, P), jnp.float32),
        grid_spec=pltpu.PrefetchScalarGridSpec(
            num_scalar_prefetch=0,
            grid=(1,),
            in_specs=[full(x_flat.shape), full(masks.shape), full(w0m.shape),
                      full(w1m.shape), full(wdm.shape), full(w2m.shape),
                      full(bn.shape)],
            out_specs=full((C, P)),
        ),
        compiler_params=pltpu.CompilerParams(
            dimension_semantics=("arbitrary",),
            vmem_limit_bytes=32 * 1024 * 1024),
    )(x_flat, masks, w0m, w1m, wdm, w2m, bn)

    return jnp.transpose(out_flat.reshape(C, N, H, W), (1, 0, 2, 3))


# ----------------------- pure-JAX reference (for validation) -----------------------
def _conv_bn_relu_ref(x, w_hwio, b, gamma, beta, *, groups=1, bf16_matmul=True):
    """Conv(+bias) -> train-mode BatchNorm(affine) -> ReLU, NHWC."""
    lhs, rhs = x, w_hwio
    if bf16_matmul:  # mirror the kernel's bf16-operand / f32-accumulate matmuls
        lhs, rhs = lhs.astype(jnp.bfloat16), rhs.astype(jnp.bfloat16)
    y = lax.conv_general_dilated(
        lhs, rhs, (1, 1), "SAME",
        dimension_numbers=("NHWC", "HWIO", "NHWC"),
        feature_group_count=groups,
        preferred_element_type=jnp.float32) + b
    mean = y.mean(axis=(0, 1, 2))
    var = ((y - mean) ** 2).mean(axis=(0, 1, 2))
    return jnp.maximum((y - mean) * lax.rsqrt(var + EPS) * gamma + beta, 0.0)


def conv_block_ref(x_nchw, params):
    x = jnp.transpose(x_nchw, (0, 2, 3, 1))                         # NHWC
    C = params["w0"].shape[0]
    to_hwio = lambda w: jnp.transpose(w, (2, 3, 1, 0))              # OIHW -> HWIO
    y0 = _conv_bn_relu_ref(x, to_hwio(params["w0"]), params["b0"],
                           params["g0"], params["be0"])
    x1 = _conv_bn_relu_ref(y0, to_hwio(params["w1"]), params["b1"],
                           params["g1"], params["be1"])
    x2 = _conv_bn_relu_ref(x1, to_hwio(params["wd"]), params["bd"],
                           params["g2"], params["be2"],
                           groups=C, bf16_matmul=False)             # depthwise in f32
    cat = jnp.concatenate([x1, x2], axis=-1)
    out = _conv_bn_relu_ref(cat, to_hwio(params["w2"]), params["b2"],
                            params["g3"], params["be3"])
    return jnp.transpose(out, (0, 3, 1, 2))


if __name__ == "__main__":
    N, Cin, C, H, W = 2, 4, 8, 16, 16          # batch=2, in_ch=4, out_ch=8, 16x16
    keys = jax.random.split(jax.random.PRNGKey(0), 18)
    rnd = lambda k, s, scale=0.1: scale * jax.random.normal(k, s, jnp.float32)

    x = jax.random.normal(keys[0], (N, Cin, H, W), jnp.float32)
    params = {
        # self.conv : Conv2d(in_ch, out_ch, 3, 1, 1, bias=True) + BN + ReLU
        "w0": rnd(keys[1], (C, Cin, 3, 3)), "b0": rnd(keys[2], (C,)),
        "g0": 1.0 + rnd(keys[3], (C,)), "be0": rnd(keys[4], (C,)),
        # ghost.primary_conv : Conv2d(out_ch, out_ch, 3, 1, 1, bias=True) + BN + ReLU
        "w1": rnd(keys[5], (C, C, 3, 3)), "b1": rnd(keys[6], (C,)),
        "g1": 1.0 + rnd(keys[7], (C,)), "be1": rnd(keys[8], (C,)),
        # ghost.cheap_operation : Conv2d(out_ch, out_ch, 3, 1, 1, groups=out_ch) + BN + ReLU
        "wd": rnd(keys[9], (C, 1, 3, 3)), "bd": rnd(keys[10], (C,)),
        "g2": 1.0 + rnd(keys[11], (C,)), "be2": rnd(keys[12], (C,)),
        # self.conv1 : Conv2d(2*out_ch, out_ch, 1, bias=True) + BN + ReLU
        "w2": rnd(keys[13], (C, 2 * C, 1, 1)), "b2": rnd(keys[14], (C,)),
        "g3": 1.0 + rnd(keys[15], (C,)), "be3": rnd(keys[16], (C,)),
    }

    out = jax.block_until_ready(conv_block_pallas(x, params))
    ref = jax.block_until_ready(conv_block_ref(x, params))

    assert out.shape == (N, C, H, W), out.shape
    max_err = float(jnp.max(jnp.abs(out - ref)))
    # tolerance covers bf16 rounding-boundary differences between two otherwise-f32
    # pipelines (both use bf16 matmul operands with f32 accumulation)
    assert jnp.allclose(out, ref, rtol=5e-3, atol=5e-3), max_err
    print("KERNEL_OK")
</pallas_src>

<mosaic_0001>
module attributes {stable_mosaic.version = 11 : i64} {
  func.func @kernel(%arg0: i32, %arg1: memref<4x512xf32, #tpu.memory_space<vmem>>, %arg2: memref<9x512xf32, #tpu.memory_space<vmem>>, %arg3: memref<8x36xbf16, #tpu.memory_space<vmem>>, %arg4: memref<8x72xbf16, #tpu.memory_space<vmem>>, %arg5: memref<8x9xf32, #tpu.memory_space<vmem>>, %arg6: memref<8x16xbf16, #tpu.memory_space<vmem>>, %arg7: memref<8x8xf32, #tpu.memory_space<vmem>>, %arg8: memref<8x512xf32, #tpu.memory_space<vmem>>) attributes {dimension_semantics = [#tpu.dimension_semantics<arbitrary>], iteration_bounds = array<i64: 1>, scalar_prefetch = 0 : i64, scratch_operands = 0 : i64, tpu.core_type = #tpu.core_type<tc>, window_params = [{pipeline_mode = #tpu.pipeline_mode<synchronous>, transform_indices = @transform_0, window_bounds = array<i64: 4, 512>}, {pipeline_mode = #tpu.pipeline_mode<synchronous>, transform_indices = @transform_1, window_bounds = array<i64: 9, 512>}, {pipeline_mode = #tpu.pipeline_mode<synchronous>, transform_indices = @transform_2, window_bounds = array<i64: 8, 36>}, {pipeline_mode = #tpu.pipeline_mode<synchronous>, transform_indices = @transform_3, window_bounds = array<i64: 8, 72>}, {pipeline_mode = #tpu.pipeline_mode<synchronous>, transform_indices = @transform_4, window_bounds = array<i64: 8, 9>}, {pipeline_mode = #tpu.pipeline_mode<synchronous>, transform_indices = @transform_5, window_bounds = array<i64: 8, 16>}, {pipeline_mode = #tpu.pipeline_mode<synchronous>, transform_indices = @transform_6, window_bounds = array<i64: 8, 8>}, {pipeline_mode = #tpu.pipeline_mode<synchronous>, transform_indices = @transform_7, window_bounds = array<i64: 8, 512>}]} {
    %c0 = arith.constant 0 : index
    %c0_0 = arith.constant 0 : index
    %0 = vector.load %arg2[%c0, %c0_0] : memref<9x512xf32, #tpu.memory_space<vmem>>, vector<1x512xf32>
    %c1 = arith.constant 1 : index
    %c0_1 = arith.constant 0 : index
    %1 = vector.load %arg2[%c1, %c0_1] : memref<9x512xf32, #tpu.memory_space<vmem>>, vector<1x512xf32>
    %c2 = arith.constant 2 : index
    %c0_2 = arith.constant 0 : index
    %2 = vector.load %arg2[%c2, %c0_2] : memref<9x512xf32, #tpu.memory_space<vmem>>, vector<1x512xf32>
    %c3 = arith.constant 3 : index
    %c0_3 = arith.constant 0 : index
    %3 = vector.load %arg2[%c3, %c0_3] : memref<9x512xf32, #tpu.memory_space<vmem>>, vector<1x512xf32>
    %c5 = arith.constant 5 : index
    %c0_4 = arith.constant 0 : index
    %4 = vector.load %arg2[%c5, %c0_4] : memref<9x512xf32, #tpu.memory_space<vmem>>, vector<1x512xf32>
    %c6 = arith.constant 6 : index
    %c0_5 = arith.constant 0 : index
    %5 = vector.load %arg2[%c6, %c0_5] : memref<9x512xf32, #tpu.memory_space<vmem>>, vector<1x512xf32>
    %c7 = arith.constant 7 : index
    %c0_6 = arith.constant 0 : index
    %6 = vector.load %arg2[%c7, %c0_6] : memref<9x512xf32, #tpu.memory_space<vmem>>, vector<1x512xf32>
    %c8 = arith.constant 8 : index
    %c0_7 = arith.constant 0 : index
    %7 = vector.load %arg2[%c8, %c0_7] : memref<9x512xf32, #tpu.memory_space<vmem>>, vector<1x512xf32>
    %c0_8 = arith.constant 0 : index
    %c0_9 = arith.constant 0 : index
    %8 = vector.load %arg3[%c0_8, %c0_9] : memref<8x36xbf16, #tpu.memory_space<vmem>>, vector<8x36xbf16>
    %c0_10 = arith.constant 0 : index
    %c0_11 = arith.constant 0 : index
    %9 = vector.load %arg1[%c0_10, %c0_11] : memref<4x512xf32, #tpu.memory_space<vmem>>, vector<4x512xf32>
    %c17_i32 = arith.constant 17 : i32
    %10 = tpu.dynamic_rotate %9 by %c17_i32 dim 1 : vector<4x512xf32>, i32 -> vector<4x512xf32>
    %11 = vector.broadcast %0 : vector<1x512xf32> to vector<4x512xf32>
    %12 = arith.mulf %10, %11 : vector<4x512xf32>
    %c16_i32 = arith.constant 16 : i32
    %13 = tpu.dynamic_rotate %9 by %c16_i32 dim 1 : vector<4x512xf32>, i32 -> vector<4x512xf32>
    %14 = vector.broadcast %1 : vector<1x512xf32> to vector<4x512xf32>
    %15 = arith.mulf %13, %14 : vector<4x512xf32>
    %c15_i32 = arith.constant 15 : i32
    %16 = tpu.dynamic_rotate %9 by %c15_i32 dim 1 : vector<4x512xf32>, i32 -> vector<4x512xf32>
    %17 = vector.broadcast %2 : vector<1x512xf32> to vector<4x512xf32>
    %18 = arith.mulf %16, %17 : vector<4x512xf32>
    %c1_i32 = arith.constant 1 : i32
    %19 = tpu.dynamic_rotate %9 by %c1_i32 dim 1 : vector<4x512xf32>, i32 -> vector<4x512xf32>
    %20 = vector.broadcast %3 : vector<1x512xf32> to vector<4x512xf32>
    %21 = arith.mulf %19, %20 : vector<4x512xf32>
    %c511_i32 = arith.constant 511 : i32
    %22 = tpu.dynamic_rotate %9 by %c511_i32 dim 1 : vector<4x512xf32>, i32 -> vector<4x512xf32>
    %23 = vector.broadcast %4 : vector<1x512xf32> to vector<4x512xf32>
    %24 = arith.mulf %22, %23 : vector<4x512xf32>
    %c497_i32 = arith.constant 497 : i32
    %25 = tpu.dynamic_rotate %9 by %c497_i32 dim 1 : vector<4x512xf32>, i32 -> vector<4x512xf32>
    %26 = vector.broadcast %5 : vector<1x512xf32> to vector<4x512xf32>
    %27 = arith.mulf %25, %26 : vector<4x512xf32>
    %c496_i32 = arith.constant 496 : i32
    %28 = tpu.dynamic_rotate %9 by %c496_i32 dim 1 : vector<4x512xf32>, i32 -> vector<4x512xf32>
    %29 = vector.broadcast %6 : vector<1x512xf32> to vector<4x512xf32>
    %30 = arith.mulf %28, %29 : vector<4x512xf32>
    %c495_i32 = arith.constant 495 : i32
    %31 = tpu.dynamic_rotate %9 by %c495_i32 dim 1 : vector<4x512xf32>, i32 -> vector<4x512xf32>
    %32 = vector.broadcast %7 : vector<1x512xf32> to vector<4x512xf32>
    %33 = arith.mulf %31, %32 : vector<4x512xf32>
    %34 = tpu.concatenate %12, %15, %18, %21, %9, %24, %27, %30, %33 in 0 : vector<4x512xf32>, vector<4x512xf32>, vector<4x512xf32>, vector<4x512xf32>, vector<4x512xf32>, vector<4x512xf32>, vector<4x512xf32>, vector<4x512xf32>, vector<4x512xf32> -> vector<36x512xf32>
    %35 = arith.truncf %34 : vector<36x512xf32> to vector<36x512xbf16>
    %cst = arith.constant dense<0.000000e+00> : vector<8x512xf32>
    %36 = tpu.matmul %8, %35, %cst {dimension_numbers = #tpu.dot_dimension_numbers<[1], [0], [0], [1], [0, 0, 1, 1], [], []>} : vector<8x36xbf16>, vector<36x512xbf16>, vector<8x512xf32> -> vector<8x512xf32>
    %c0_12 = arith.constant 0 : index
    %c0_13 = arith.constant 0 : index
    %37 = vector.load %arg7[%c0_12, %c0_13] : memref<8x8xf32, #tpu.memory_space<vmem>>, vector<8x1xf32>
    %c0_14 = arith.constant 0 : index
    %c1_15 = arith.constant 1 : index
    %38 = vector.load %arg7[%c0_14, %c1_15] : memref<8x8xf32, #tpu.memory_space<vmem>>, vector<8x1xf32>
    %cst_16 = arith.constant dense<0.000000e+00> : vector<8xf32>
    %39 = vector.multi_reduction <add>, %36, %cst_16 [1] : vector<8x512xf32> to vector<8xf32>
    %40 = vector.shape_cast %39 : vector<8xf32> to vector<8x1xf32>
    %41 = arith.mulf %36, %36 : vector<8x512xf32>
    %cst_17 = arith.constant dense<0.000000e+00> : vector<8xf32>
    %42 = vector.multi_reduction <add>, %41, %cst_17 [1] : vector<8x512xf32> to vector<8xf32>
    %43 = vector.shape_cast %42 : vector<8xf32> to vector<8x1xf32>
    %cst_18 = arith.constant 0.001953125 : f32
    %44 = vector.broadcast %cst_18 : f32 to vector<8x1xf32>
    %45 = arith.mulf %40, %44 : vector<8x1xf32>
    %cst_19 = arith.constant 0.001953125 : f32
    %46 = vector.broadcast %cst_19 : f32 to vector<8x1xf32>
    %47 = arith.mulf %43, %46 : vector<8x1xf32>
    %48 = arith.mulf %45, %45 : vector<8x1xf32>
    %49 = arith.subf %47, %48 : vector<8x1xf32>
    %cst_20 = arith.constant 0.000000e+00 : f32
    %50 = vector.broadcast %cst_20 : f32 to vector<8x1xf32>
    %51 = arith.maximumf %49, %50 : vector<8x1xf32>
    %cst_21 = arith.constant 9.99999974E-6 : f32
    %52 = vector.broadcast %cst_21 : f32 to vector<8x1xf32>
    %53 = arith.addf %51, %52 : vector<8x1xf32>
    %54 = math.rsqrt %53 : vector<8x1xf32>
    %55 = arith.mulf %37, %54 : vector<8x1xf32>
    %56 = arith.mulf %45, %55 : vector<8x1xf32>
    %57 = arith.subf %38, %56 : vector<8x1xf32>
    %58 = vector.broadcast %55 : vector<8x1xf32> to vector<8x512xf32>
    %59 = arith.mulf %36, %58 : vector<8x512xf32>
    %60 = vector.broadcast %57 : vector<8x1xf32> to vector<8x512xf32>
    %61 = arith.addf %59, %60 : vector<8x512xf32>
    %cst_22 = arith.constant 0.000000e+00 : f32
    %62 = vector.broadcast %cst_22 : f32 to vector<8x512xf32>
    %63 = arith.maximumf %61, %62 : vector<8x512xf32>
    %c0_23 = arith.constant 0 : index
    %c0_24 = arith.constant 0 : index
    %64 = vector.load %arg4[%c0_23, %c0_24] : memref<8x72xbf16, #tpu.memory_space<vmem>>, vector<8x72xbf16>
    %c17_i32_25 = arith.constant 17 : i32
    %65 = tpu.dynamic_rotate %63 by %c17_i32_25 dim 1 : vector<8x512xf32>, i32 -> vector<8x512xf32>
    %66 = vector.broadcast %0 : vector<1x512xf32> to vector<8x512xf32>
    %67 = arith.mulf %65, %66 : vector<8x512xf32>
    %c16_i32_26 = arith.constant 16 : i32
    %68 = tpu.dynamic_rotate %63 by %c16_i32_26 dim 1 : vector<8x512xf32>, i32 -> vector<8x512xf32>
    %69 = vector.broadcast %1 : vector<1x512xf32> to vector<8x512xf32>
    %70 = arith.mulf %68, %69 : vector<8x512xf32>
    %c15_i32_27 = arith.constant 15 : i32
    %71 = tpu.dynamic_rotate %63 by %c15_i32_27 dim 1 : vector<8x512xf32>, i32 -> vector<8x512xf32>
    %72 = vector.broadcast %2 : vector<1x512xf32> to vector<8x512xf32>
    %73 = arith.mulf %71, %72 : vector<8x512xf32>
    %c1_i32_28 = arith.constant 1 : i32
    %74 = tpu.dynamic_rotate %63 by %c1_i32_28 dim 1 : vector<8x512xf32>, i32 -> vector<8x512xf32>
    %75 = vector.broadcast %3 : vector<1x512xf32> to vector<8x512xf32>
    %76 = arith.mulf %74, %75 : vector<8x512xf32>
    %c511_i32_29 = arith.constant 511 : i32
    %77 = tpu.dynamic_rotate %63 by %c511_i32_29 dim 1 : vector<8x512xf32>, i32 -> vector<8x512xf32>
    %78 = vector.broadcast %4 : vector<1x512xf32> to vector<8x512xf32>
    %79 = arith.mulf %77, %78 : vector<8x512xf32>
    %c497_i32_30 = arith.constant 497 : i32
    %80 = tpu.dynamic_rotate %63 by %c497_i32_30 dim 1 : vector<8x512xf32>, i32 -> vector<8x512xf32>
    %81 = vector.broadcast %5 : vector<1x512xf32> to vector<8x512xf32>
    %82 = arith.mulf %80, %81 : vector<8x512xf32>
    %c496_i32_31 = arith.constant 496 : i32
    %83 = tpu.dynamic_rotate %63 by %c496_i32_31 dim 1 : vector<8x512xf32>, i32 -> vector<8x512xf32>
    %84 = vector.broadcast %6 : vector<1x512xf32> to vector<8x512xf32>
    %85 = arith.mulf %83, %84 : vector<8x512xf32>
    %c495_i32_32 = arith.constant 495 : i32
    %86 = tpu.dynamic_rotate %63 by %c495_i32_32 dim 1 : vector<8x512xf32>, i32 -> vector<8x512xf32>
    %87 = vector.broadcast %7 : vector<1x512xf32> to vector<8x512xf32>
    %88 = arith.mulf %86, %87 : vector<8x512xf32>
    %89 = tpu.concatenate %67, %70, %73, %76, %63, %79, %82, %85, %88 in 0 : vector<8x512xf32>, vector<8x512xf32>, vector<8x512xf32>, vector<8x512xf32>, vector<8x512xf32>, vector<8x512xf32>, vector<8x512xf32>, vector<8x512xf32>, vector<8x512xf32> -> vector<72x512xf32>
    %90 = arith.truncf %89 : vector<72x512xf32> to vector<72x512xbf16>
    %cst_33 = arith.constant dense<0.000000e+00> : vector<8x512xf32>
    %91 = tpu.matmul %64, %90, %cst_33 {dimension_numbers = #tpu.dot_dimension_numbers<[1], [0], [0], [1], [0, 0, 1, 1], [], []>} : vector<8x72xbf16>, vector<72x512xbf16>, vector<8x512xf32> -> vector<8x512xf32>
    %c0_34 = arith.constant 0 : index
    %c2_35 = arith.constant 2 : index
    %92 = vector.load %arg7[%c0_34, %c2_35] : memref<8x8xf32, #tpu.memory_space<vmem>>, vector<8x1xf32>
    %c0_36 = arith.constant 0 : index
    %c3_37 = arith.constant 3 : index
    %93 = vector.load %arg7[%c0_36, %c3_37] : memref<8x8xf32, #tpu.memory_space<vmem>>, vector<8x1xf32>
    %cst_38 = arith.constant dense<0.000000e+00> : vector<8xf32>
    %94 = vector.multi_reduction <add>, %91, %cst_38 [1] : vector<8x512xf32> to vector<8xf32>
    %95 = vector.shape_cast %94 : vector<8xf32> to vector<8x1xf32>
    %96 = arith.mulf %91, %91 : vector<8x512xf32>
    %cst_39 = arith.constant dense<0.000000e+00> : vector<8xf32>
    %97 = vector.multi_reduction <add>, %96, %cst_39 [1] : vector<8x512xf32> to vector<8xf32>
    %98 = vector.shape_cast %97 : vector<8xf32> to vector<8x1xf32>
    %cst_40 = arith.constant 0.001953125 : f32
    %99 = vector.broadcast %cst_40 : f32 to vector<8x1xf32>
    %100 = arith.mulf %95, %99 : vector<8x1xf32>
    %cst_41 = arith.constant 0.001953125 : f32
    %101 = vector.broadcast %cst_41 : f32 to vector<8x1xf32>
    %102 = arith.mulf %98, %101 : vector<8x1xf32>
    %103 = arith.mulf %100, %100 : vector<8x1xf32>
    %104 = arith.subf %102, %103 : vector<8x1xf32>
    %cst_42 = arith.constant 0.000000e+00 : f32
    %105 = vector.broadcast %cst_42 : f32 to vector<8x1xf32>
    %106 = arith.maximumf %104, %105 : vector<8x1xf32>
    %cst_43 = arith.constant 9.99999974E-6 : f32
    %107 = vector.broadcast %cst_43 : f32 to vector<8x1xf32>
    %108 = arith.addf %106, %107 : vector<8x1xf32>
    %109 = math.rsqrt %108 : vector<8x1xf32>
    %110 = arith.mulf %92, %109 : vector<8x1xf32>
    %111 = arith.mulf %100, %110 : vector<8x1xf32>
    %112 = arith.subf %93, %111 : vector<8x1xf32>
    %113 = vector.broadcast %110 : vector<8x1xf32> to vector<8x512xf32>
    %114 = arith.mulf %91, %113 : vector<8x512xf32>
    %115 = vector.broadcast %112 : vector<8x1xf32> to vector<8x512xf32>
    %116 = arith.addf %114, %115 : vector<8x512xf32>
    %cst_44 = arith.constant 0.000000e+00 : f32
    %117 = vector.broadcast %cst_44 : f32 to vector<8x512xf32>
    %118 = arith.maximumf %116, %117 : vector<8x512xf32>
    %c0_45 = arith.constant 0 : index
    %c4 = arith.constant 4 : index
    %119 = vector.load %arg5[%c0_45, %c4] : memref<8x9xf32, #tpu.memory_space<vmem>>, vector<8x1xf32>
    %120 = vector.broadcast %119 : vector<8x1xf32> to vector<8x512xf32>
    %121 = arith.mulf %118, %120 : vector<8x512xf32>
    %c17_i32_46 = arith.constant 17 : i32
    %122 = tpu.dynamic_rotate %118 by %c17_i32_46 dim 1 : vector<8x512xf32>, i32 -> vector<8x512xf32>
    %123 = vector.broadcast %0 : vector<1x512xf32> to vector<8x512xf32>
    %124 = arith.mulf %122, %123 : vector<8x512xf32>
    %c0_47 = arith.constant 0 : index
    %c0_48 = arith.constant 0 : index
    %125 = vector.load %arg5[%c0_47, %c0_48] : memref<8x9xf32, #tpu.memory_space<vmem>>, vector<8x1xf32>
    %126 = vector.broadcast %125 : vector<8x1xf32> to vector<8x512xf32>
    %127 = arith.mulf %124, %126 : vector<8x512xf32>
    %128 = arith.addf %121, %127 : vector<8x512xf32>
    %c16_i32_49 = arith.constant 16 : i32
    %129 = tpu.dynamic_rotate %118 by %c16_i32_49 dim 1 : vector<8x512xf32>, i32 -> vector<8x512xf32>
    %130 = vector.broadcast %1 : vector<1x512xf32> to vector<8x512xf32>
    %131 = arith.mulf %129, %130 : vector<8x512xf32>
    %c0_50 = arith.constant 0 : index
    %c1_51 = arith.constant 1 : index
    %132 = vector.load %arg5[%c0_50, %c1_51] : memref<8x9xf32, #tpu.memory_space<vmem>>, vector<8x1xf32>
    %133 = vector.broadcast %132 : vector<8x1xf32> to vector<8x512xf32>
    %134 = arith.mulf %131, %133 : vector<8x512xf32>
    %135 = arith.addf %128, %134 : vector<8x512xf32>
    %c15_i32_52 = arith.constant 15 : i32
    %136 = tpu.dynamic_rotate %118 by %c15_i32_52 dim 1 : vector<8x512xf32>, i32 -> vector<8x512xf32>
    %137 = vector.broadcast %2 : vector<1x512xf32> to vector<8x512xf32>
    %138 = arith.mulf %136, %137 : vector<8x512xf32>
    %c0_53 = arith.constant 0 : index
    %c2_54 = arith.constant 2 : index
    %139 = vector.load %arg5[%c0_53, %c2_54] : memref<8x9xf32, #tpu.memory_space<vmem>>, vector<8x1xf32>
    %140 = vector.broadcast %139 : vector<8x1xf32> to vector<8x512xf32>
    %141 = arith.mulf %138, %140 : vector<8x512xf32>
    %142 = arith.addf %135, %141 : vector<8x512xf32>
    %c1_i32_55 = arith.constant 1 : i32
    %143 = tpu.dynamic_rotate %118 by %c1_i32_55 dim 1 : vector<8x512xf32>, i32 -> vector<8x512xf32>
    %144 = vector.broadcast %3 : vector<1x512xf32> to vector<8x512xf32>
    %145 = arith.mulf %143, %144 : vector<8x512xf32>
    %c0_56 = arith.constant 0 : index
    %c3_57 = arith.constant 3 : index
    %146 = vector.load %arg5[%c0_56, %c3_57] : memref<8x9xf32, #tpu.memory_space<vmem>>, vector<8x1xf32>
    %147 = vector.broadcast %146 : vector<8x1xf32> to vector<8x512xf32>
    %148 = arith.mulf %145, %147 : vector<8x512xf32>
    %149 = arith.addf %142, %148 : vector<8x512xf32>
    %c511_i32_58 = arith.constant 511 : i32
    %150 = tpu.dynamic_rotate %118 by %c511_i32_58 dim 1 : vector<8x512xf32>, i32 -> vector<8x512xf32>
    %151 = vector.broadcast %4 : vector<1x512xf32> to vector<8x512xf32>
    %152 = arith.mulf %150, %151 : vector<8x512xf32>
    %c0_59 = arith.constant 0 : index
    %c5_60 = arith.constant 5 : index
    %153 = vector.load %arg5[%c0_59, %c5_60] : memref<8x9xf32, #tpu.memory_space<vmem>>, vector<8x1xf32>
    %154 = vector.broadcast %153 : vector<8x1xf32> to vector<8x512xf32>
    %155 = arith.mulf %152, %154 : vector<8x512xf32>
    %156 = arith.addf %149, %155 : vector<8x512xf32>
    %c497_i32_61 = arith.constant 497 : i32
    %157 = tpu.dynamic_rotate %118 by %c497_i32_61 dim 1 : vector<8x512xf32>, i32 -> vector<8x512xf32>
    %158 = vector.broadcast %5 : vector<1x512xf32> to vector<8x512xf32>
    %159 = arith.mulf %157, %158 : vector<8x512xf32>
    %c0_62 = arith.constant 0 : index
    %c6_63 = arith.constant 6 : index
    %160 = vector.load %arg5[%c0_62, %c6_63] : memref<8x9xf32, #tpu.memory_space<vmem>>, vector<8x1xf32>
    %161 = vector.broadcast %160 : vector<8x1xf32> to vector<8x512xf32>
    %162 = arith.mulf %159, %161 : vector<8x512xf32>
    %163 = arith.addf %156, %162 : vector<8x512xf32>
    %c496_i32_64 = arith.constant 496 : i32
    %164 = tpu.dynamic_rotate %118 by %c496_i32_64 dim 1 : vector<8x512xf32>, i32 -> vector<8x512xf32>
    %165 = vector.broadcast %6 : vector<1x512xf32> to vector<8x512xf32>
    %166 = arith.mulf %164, %165 : vector<8x512xf32>
    %c0_65 = arith.constant 0 : index
    %c7_66 = arith.constant 7 : index
    %167 = vector.load %arg5[%c0_65, %c7_66] : memref<8x9xf32, #tpu.memory_space<vmem>>, vector<8x1xf32>
    %168 = vector.broadcast %167 : vector<8x1xf32> to vector<8x512xf32>
    %169 = arith.mulf %166, %168 : vector<8x512xf32>
    %170 = arith.addf %163, %169 : vector<8x512xf32>
    %c495_i32_67 = arith.constant 495 : i32
    %171 = tpu.dynamic_rotate %118 by %c495_i32_67 dim 1 : vector<8x512xf32>, i32 -> vector<8x512xf32>
    %172 = vector.broadcast %7 : vector<1x512xf32> to vector<8x512xf32>
    %173 = arith.mulf %171, %172 : vector<8x512xf32>
    %c0_68 = arith.constant 0 : index
    %c8_69 = arith.constant 8 : index
    %174 = vector.load %arg5[%c0_68, %c8_69] : memref<8x9xf32, #tpu.memory_space<vmem>>, vector<8x1xf32>
    %175 = vector.broadcast %174 : vector<8x1xf32> to vector<8x512xf32>
    %176 = arith.mulf %173, %175 : vector<8x512xf32>
    %177 = arith.addf %170, %176 : vector<8x512xf32>
    %c0_70 = arith.constant 0 : index
    %c4_71 = arith.constant 4 : index
    %178 = vector.load %arg7[%c0_70, %c4_71] : memref<8x8xf32, #tpu.memory_space<vmem>>, vector<8x1xf32>
    %c0_72 = arith.constant 0 : index
    %c5_73 = arith.constant 5 : index
    %179 = vector.load %arg7[%c0_72, %c5_73] : memref<8x8xf32, #tpu.memory_space<vmem>>, vector<8x1xf32>
    %cst_74 = arith.constant dense<0.000000e+00> : vector<8xf32>
    %180 = vector.multi_reduction <add>, %177, %cst_74 [1] : vector<8x512xf32> to vector<8xf32>
    %181 = vector.shape_cast %180 : vector<8xf32> to vector<8x1xf32>
    %182 = arith.mulf %177, %177 : vector<8x512xf32>
    %cst_75 = arith.constant dense<0.000000e+00> : vector<8xf32>
    %183 = vector.multi_reduction <add>, %182, %cst_75 [1] : vector<8x512xf32> to vector<8xf32>
    %184 = vector.shape_cast %183 : vector<8xf32> to vector<8x1xf32>
    %cst_76 = arith.constant 0.001953125 : f32
    %185 = vector.broadcast %cst_76 : f32 to vector<8x1xf32>
    %186 = arith.mulf %181, %185 : vector<8x1xf32>
    %cst_77 = arith.constant 0.001953125 : f32
    %187 = vector.broadcast %cst_77 : f32 to vector<8x1xf32>
    %188 = arith.mulf %184, %187 : vector<8x1xf32>
    %189 = arith.mulf %186, %186 : vector<8x1xf32>
    %190 = arith.subf %188, %189 : vector<8x1xf32>
    %cst_78 = arith.constant 0.000000e+00 : f32
    %191 = vector.broadcast %cst_78 : f32 to vector<8x1xf32>
    %192 = arith.maximumf %190, %191 : vector<8x1xf32>
    %cst_79 = arith.constant 9.99999974E-6 : f32
    %193 = vector.broadcast %cst_79 : f32 to vector<8x1xf32>
    %194 = arith.addf %192, %193 : vector<8x1xf32>
    %195 = math.rsqrt %194 : vector<8x1xf32>
    %196 = arith.mulf %178, %195 : vector<8x1xf32>
    %197 = arith.mulf %186, %196 : vector<8x1xf32>
    %198 = arith.subf %179, %197 : vector<8x1xf32>
    %199 = vector.broadcast %196 : vector<8x1xf32> to vector<8x512xf32>
    %200 = arith.mulf %177, %199 : vector<8x512xf32>
    %201 = vector.broadcast %198 : vector<8x1xf32> to vector<8x512xf32>
    %202 = arith.addf %200, %201 : vector<8x512xf32>
    %cst_80 = arith.constant 0.000000e+00 : f32
    %203 = vector.broadcast %cst_80 : f32 to vector<8x512xf32>
    %204 = arith.maximumf %202, %203 : vector<8x512xf32>
    %c0_81 = arith.constant 0 : index
    %c0_82 = arith.constant 0 : index
    %205 = vector.load %arg6[%c0_81, %c0_82] : memref<8x16xbf16, #tpu.memory_space<vmem>>, vector<8x8xbf16>
    %206 = arith.truncf %118 : vector<8x512xf32> to vector<8x512xbf16>
    %cst_83 = arith.constant dense<0.000000e+00> : vector<8x512xf32>
    %207 = tpu.matmul %205, %206, %cst_83 {dimension_numbers = #tpu.dot_dimension_numbers<[1], [0], [0], [1], [0, 0, 1, 1], [], []>} : vector<8x8xbf16>, vector<8x512xbf16>, vector<8x512xf32> -> vector<8x512xf32>
    %c0_84 = arith.constant 0 : index
    %c8_85 = arith.constant 8 : index
    %208 = vector.load %arg6[%c0_84, %c8_85] : memref<8x16xbf16, #tpu.memory_space<vmem>>, vector<8x8xbf16>
    %209 = arith.truncf %204 : vector<8x512xf32> to vector<8x512xbf16>
    %cst_86 = arith.constant dense<0.000000e+00> : vector<8x512xf32>
    %210 = tpu.matmul %208, %209, %cst_86 {dimension_numbers = #tpu.dot_dimension_numbers<[1], [0], [0], [1], [0, 0, 1, 1], [], []>} : vector<8x8xbf16>, vector<8x512xbf16>, vector<8x512xf32> -> vector<8x512xf32>
    %211 = arith.addf %207, %210 : vector<8x512xf32>
    %c0_87 = arith.constant 0 : index
    %c6_88 = arith.constant 6 : index
    %212 = vector.load %arg7[%c0_87, %c6_88] : memref<8x8xf32, #tpu.memory_space<vmem>>, vector<8x1xf32>
    %c0_89 = arith.constant 0 : index
    %c7_90 = arith.constant 7 : index
    %213 = vector.load %arg7[%c0_89, %c7_90] : memref<8x8xf32, #tpu.memory_space<vmem>>, vector<8x1xf32>
    %cst_91 = arith.constant dense<0.000000e+00> : vector<8xf32>
    %214 = vector.multi_reduction <add>, %211, %cst_91 [1] : vector<8x512xf32> to vector<8xf32>
    %215 = vector.shape_cast %214 : vector<8xf32> to vector<8x1xf32>
    %216 = arith.mulf %211, %211 : vector<8x512xf32>
    %cst_92 = arith.constant dense<0.000000e+00> : vector<8xf32>
    %217 = vector.multi_reduction <add>, %216, %cst_92 [1] : vector<8x512xf32> to vector<8xf32>
    %218 = vector.shape_cast %217 : vector<8xf32> to vector<8x1xf32>
    %cst_93 = arith.constant 0.001953125 : f32
    %219 = vector.broadcast %cst_93 : f32 to vector<8x1xf32>
    %220 = arith.mulf %215, %219 : vector<8x1xf32>
    %cst_94 = arith.constant 0.001953125 : f32
    %221 = vector.broadcast %cst_94 : f32 to vector<8x1xf32>
    %222 = arith.mulf %218, %221 : vector<8x1xf32>
    %223 = arith.mulf %220, %220 : vector<8x1xf32>
    %224 = arith.subf %222, %223 : vector<8x1xf32>
    %cst_95 = arith.constant 0.000000e+00 : f32
    %225 = vector.broadcast %cst_95 : f32 to vector<8x1xf32>
    %226 = arith.maximumf %224, %225 : vector<8x1xf32>
    %cst_96 = arith.constant 9.99999974E-6 : f32
    %227 = vector.broadcast %cst_96 : f32 to vector<8x1xf32>
    %228 = arith.addf %226, %227 : vector<8x1xf32>
    %229 = math.rsqrt %228 : vector<8x1xf32>
    %230 = arith.mulf %212, %229 : vector<8x1xf32>
    %231 = arith.mulf %220, %230 : vector<8x1xf32>
    %232 = arith.subf %213, %231 : vector<8x1xf32>
    %233 = vector.broadcast %230 : vector<8x1xf32> to vector<8x512xf32>
    %234 = arith.mulf %211, %233 : vector<8x512xf32>
    %235 = vector.broadcast %232 : vector<8x1xf32> to vector<8x512xf32>
    %236 = arith.addf %234, %235 : vector<8x512xf32>
    %cst_97 = arith.constant 0.000000e+00 : f32
    %237 = vector.broadcast %cst_97 : f32 to vector<8x512xf32>
    %238 = arith.maximumf %236, %237 : vector<8x512xf32>
    %c0_98 = arith.constant 0 : index
    %c0_99 = arith.constant 0 : index
    %239 = vector.load %arg8[%c0_98, %c0_99] : memref<8x512xf32, #tpu.memory_space<vmem>>, vector<8x512xf32>
    tpu.vector_store %arg8[%c0_98, %c0_99], %238 {strides = array<i32>} : memref<8x512xf32, #tpu.memory_space<vmem>>, vector<8x512xf32>,
    return
  }
  func.func @transform_0(%arg0: i32) -> (i32, i32) {
    %c0_i32 = arith.constant 0 : i32
    %c0_i32_0 = arith.constant 0 : i32
    %c0_i32_1 = arith.constant 0 : i32
    return %c0_i32, %c0_i32_0 : i32, i32
  }
  func.func @transform_1(%arg0: i32) -> (i32, i32) {
    %c0_i32 = arith.constant 0 : i32
    %c0_i32_0 = arith.constant 0 : i32
    %c0_i32_1 = arith.constant 0 : i32
    return %c0_i32, %c0_i32_0 : i32, i32
  }
  func.func @transform_2(%arg0: i32) -> (i32, i32) {
    %c0_i32 = arith.constant 0 : i32
    %c0_i32_0 = arith.constant 0 : i32
    %c0_i32_1 = arith.constant 0 : i32
    return %c0_i32, %c0_i32_0 : i32, i32
  }
  func.func @transform_3(%arg0: i32) -> (i32, i32) {
    %c0_i32 = arith.constant 0 : i32
    %c0_i32_0 = arith.constant 0 : i32
    %c0_i32_1 = arith.constant 0 : i32
    return %c0_i32, %c0_i32_0 : i32, i32
  }
  func.func @transform_4(%arg0: i32) -> (i32, i32) {
    %c0_i32 = arith.constant 0 : i32
    %c0_i32_0 = arith.constant 0 : i32
    %c0_i32_1 = arith.constant 0 : i32
    return %c0_i32, %c0_i32_0 : i32, i32
  }
  func.func @transform_5(%arg0: i32) -> (i32, i32) {
    %c0_i32 = arith.constant 0 : i32
    %c0_i32_0 = arith.constant 0 : i32
    %c0_i32_1 = arith.constant 0 : i32
    return %c0_i32, %c0_i32_0 : i32, i32
  }
  func.func @transform_6(%arg0: i32) -> (i32, i32) {
    %c0_i32 = arith.constant 0 : i32
    %c0_i32_0 = arith.constant 0 : i32
    %c0_i32_1 = arith.constant 0 : i32
    return %c0_i32, %c0_i32_0 : i32, i32
  }
  func.func @transform_7(%arg0: i32) -> (i32, i32) {
    %c0_i32 = arith.constant 0 : i32
    %c0_i32_0 = arith.constant 0 : i32
    %c0_i32_1 = arith.constant 0 : i32
    return %c0_i32, %c0_i32_0 : i32, i32
  }
}

</mosaic_0001>

<bundles_post_ra>
// kernel: conv_block_pallas.1
= control target key start
LH: loop header
LB: loop body
LE: loop exit
PB: predicated region body
PF: predicated region fallthrough
CT: control target
= control target key end

     0   :  { %s1512_s26 = smov 1   ;;  %s1513_s27 = smov 16   ;;  %v2436_v4 = vmov 0   ;;  %v59_v5 = vlaneseq  ;;  %vm405_vm4 = vcmask 1043456   ;;  %vm438_vm9 = vcmask 1041408   ;;  %s2427_s0 = inlined_call_operand.vmem [shape: f32[4,512], index: 0, kind: input, shape index: {}]   ;;  %s2428_s1 = inlined_call_operand.vmem [shape: f32[9,512], index: 1, kind: input, shape index: {}]   ;;  %s2429_s2 = inlined_call_operand.vmem [shape: bf16[8,36], index: 2, kind: input, shape index: {}]   ;;  %s2430_s6 = inlined_call_operand.vmem [shape: f32[8,8], index: 6, kind: input, shape index: {}]   ;;  %s2431_s3 = inlined_call_operand.vmem [shape: bf16[8,72], index: 3, kind: input, shape index: {}]   ;;  %s2432_s4 = inlined_call_operand.vmem [shape: f32[8,9], index: 4, kind: input, shape index: {}]   ;;  %s2433_s5 = inlined_call_operand.vmem [shape: bf16[8,16], index: 5, kind: input, shape index: {}]   ;;  %s2434_s7 = inlined_call_operand.vmem [shape: f32[8,512], index: 7, kind: output, shape index: {}]  }
   0x1   :  { %v1573_v0 = vld [vmem:[%s2427_s0] sm:$0xff]  ;;  %v1586_v2 = vld [vmem:[%s2427_s0 + $0x8] sm:$0xff]  ;;  %s1514_s30 = smov 17   ;;  %s1515_s0 = smov 15   ;;  %483 = vmatprep.mubr.bf16.mxu0 %v2436_v4  ;;  %524 = vmatprep.mubr.bf16.mxu1 %v2436_v4  ;;  %vm434_vm10 = vcmask 293888   ;;  %vm733_vm11 = vcmask 588800  }
   0x2   :  { %167 = vrot.lane.b32.xlu1 %v1573_v0, %s1512_s26  ;;  %91 = vrot.lane.b32.xlu0 %v1573_v0, %s1513_s27  ;;  %v1581_v1 = vcombine.high %v1573_v0, %v1573_v0  ;;  %v1594_v3 = vcombine.high %v1586_v2, %v1586_v2  ;;  %s1516_s8 = smov 127   ;;  %s1517_s9 = smov 112   ;;  %v68_v8 = vshrl.u32 %v59_v5, 7  ;;  %v1655_v9 = vand.u32 127, %v59_v5 }
   0x3   :  { %s1518_s10 = smov 113   ;;  %1482 = vset.pattern.permute.xlu1 %v2436_v4  ;;  %s1520_s11 = smov 111   ;;  %v1434_v13 = vld [vmem:[%s2428_s1 + $0x3] ss:$8 sm:$0xf]  ;;  %vm1179_vm12 = vcmask 64512  }
   0x4   :  { %v1659_v12 = vsub.s32 1, %v68_v8  ;;  %v1432_v14 = vld [vmem:[%s2428_s1 + $0x1] ss:$8 sm:$0xf]  ;;  %vm175_vm0 = vcmp.lt.s32.totalorder %v1655_v9, 1  ;;  %vm99_vm1 = vcmp.lt.s32.totalorder %v1655_v9, 16 }
   0x5   :  { %v1672_v17 = vld [vmem:[%s2428_s1] ss:$8 sm:$0xf]  ;;  %vm61_vm2 = vcmp.lt.s32.totalorder %v1655_v9, 17  ;;  %v1697_v26 = vsub.s32 0, %v68_v8  ;;  %vm137_vm3 = vcmp.lt.s32.totalorder %v1655_v9, 15 }
   0x6   :  { %169 = vrot.lane.b32.xlu1 %v1581_v1, %s1512_s26  ;;  %93 = vrot.lane.b32.xlu0 %v1581_v1, %s1513_s27  ;;  %v1675_v18 = vrot.slane %v1434_v13, %v1659_v12  ;;  %v1678_v19 = vrot.slane %v1432_v14, %v1659_v12  ;;  %v1689_v22 = vld [vmem:[%s2428_s1 + $0x2] ss:$8 sm:$0xf]  ;;  %v1695_v24 = vrot.slane %v1672_v17, %v1659_v12  ;;  %v1740_v52 = vsub.s32 2, %v68_v8 }
   0x7   :  { %v1707_v30 = vrot.slane %v1689_v22, %v1659_v12  ;;  %v1713_v34 = vrot.slane %v1434_v13, %v1697_v26  ;;  %v1719_v38 = vrot.slane %v1432_v14, %v1697_v26  ;;  %v1728_v43 = vrot.slane %v1672_v17, %v1697_v26 }
   0x8   :  { %v1738_v51 = vrot.slane %v1689_v22, %v1697_v26  ;;  %v1742_v53 = vsub.s32 3, %v68_v8  ;;  %v1749_v61 = vrot.slane %v1432_v14, %v1740_v52  ;;  %v1755_v63 = vrot.slane %v1434_v13, %v1740_v52 }
   0x9   :  { %vm213_vm5 = vcmp.lt.s32.totalorder %v1655_v9, 127  ;;  %vm289_vm6 = vcmp.lt.s32.totalorder %v1655_v9, 112  ;;  %vm251_vm7 = vcmp.lt.s32.totalorder %v1655_v9, 113  ;;  %vm327_vm8 = vcmp.lt.s32.totalorder %v1655_v9, 111 }
   0xa   :  { %173 = vrot.lane.b32.xlu1 %v1594_v3, %s1512_s26  ;;  %97 = vrot.lane.b32.xlu0 %v1594_v3, %s1513_s27  ;;  %v1752_v62 = vrot.slane %v1432_v14, %v1742_v53 }
   0xe   :  { %53 = vrot.lane.b32.xlu1 %v1581_v1, %s1514_s30  ;;  %51 = vrot.lane.b32.xlu0 %v1573_v0, %s1514_s30 }
  0x12   :  { %131 = vrot.lane.b32.xlu1 %v1581_v1, %s1515_s0  ;;  %129 = vrot.lane.b32.xlu0 %v1573_v0, %s1515_s0 }
  0x16   :  { %95 = vrot.lane.b32.xlu1 %v1586_v2, %s1513_s27  ;;  %57 = vrot.lane.b32.xlu0 %v1594_v3, %s1514_s30 }
  0x1a   :  { %171 = vrot.lane.b32.xlu1 %v1586_v2, %s1512_s26  ;;  %135 = vrot.lane.b32.xlu0 %v1594_v3, %s1515_s0 }
  0x1e   :  { %209 = vrot.lane.b32.xlu1 %v1586_v2, %s1516_s8  ;;  %207 = vrot.lane.b32.xlu0 %v1581_v1, %s1516_s8 }
  0x22   :  { %285 = vrot.lane.b32.xlu1 %v1586_v2, %s1517_s9  ;;  %283 = vrot.lane.b32.xlu0 %v1581_v1, %s1517_s9 }
  0x26   :  { %133 = vrot.lane.b32.xlu1 %v1586_v2, %s1515_s0  ;;  %55 = vrot.lane.b32.xlu0 %v1586_v2, %s1514_s30 }
  0x2a   :  { %281 = vrot.lane.b32.xlu1 %v1573_v0, %s1517_s9  ;;  %205 = vrot.lane.b32.xlu0 %v1573_v0, %s1516_s8 }
  0x2e   :  { %247 = vrot.lane.b32.xlu1 %v1586_v2, %s1518_s10  ;;  %245 = vrot.lane.b32.xlu0 %v1581_v1, %s1518_s10 }
  0x32   :  { %243 = vrot.lane.b32.xlu1 %v1573_v0, %s1518_s10  ;;  %211 = vrot.lane.b32.xlu0 %v1594_v3, %s1516_s8 }
  0x36   :  { %249 = vrot.lane.b32.xlu1 %v1594_v3, %s1518_s10  ;;  %287 = vrot.lane.b32.xlu0 %v1594_v3, %s1517_s9 }
  0x3a   :  { %321 = vrot.lane.b32.xlu1 %v1581_v1, %s1520_s11  ;;  %319 = vrot.lane.b32.xlu0 %v1573_v0, %s1520_s11 }
  0x3e   :  { %325 = vrot.lane.b32.xlu1 %v1594_v3, %s1520_s11  ;;  %323 = vrot.lane.b32.xlu0 %v1586_v2, %s1520_s11 }
  0x74   :  { %v168_v6 = vpop.permute.xlu1 %167  ;;  %v92_v7 = vpop.permute.xlu0 %91 }
  0x78   :  { %v1657_v10 = vpop.permute.xlu1 %169  ;;  %v94_v11 = vpop.permute.xlu0 %93 }
  0x79   :  { %v178_v20 = vsel %vm175_vm0, %v168_v6, %v1657_v10  ;;  %v102_v21 = vsel %vm99_vm1, %v92_v7, %v94_v11 }
  0x7a   :  { %v202_v28 = vmul.f32 %v1675_v18, %v178_v20  ;;  %v126_v29 = vmul.f32 %v1678_v19, %v102_v21 }
  0x7c   :  { %v174_v15 = vpop.permute.xlu1 %173  ;;  %v98_v16 = vpop.permute.xlu0 %97  ;;  %v374_v36 = vrot.slane %v202_v28, 4  ;;  %v362_v37 = vrot.slane %v126_v29, 4 }
  0x7d   :  { %v179_v40 = vsel %vm175_vm0, %v174_v15, %v168_v6  ;;  %v103_v41 = vsel %vm99_vm1, %v98_v16, %v92_v7  ;;  %v1760_v6 = vrot.slane %v1434_v13, %v1742_v53 }
  0x7e   :  { %v201_v49 = vmul.f32 %v1713_v34, %v179_v40  ;;  %v125_v50 = vmul.f32 %v1719_v38, %v103_v41 }
  0x80   :  { %v1691_v23 = vpop.permute.xlu1 %53  ;;  %v52_v25 = vpop.permute.xlu0 %51  ;;  %v373_v58 = vrot.slane %v201_v49, 4  ;;  %v361_v59 = vrot.slane %v125_v50, 4 }
  0x81   :  { %v64_v27 = vsel %vm61_vm2, %v52_v25, %v1691_v23 }
  0x82   :  { %v88_v31 = vmul.f32 %v1695_v24, %v64_v27 }
  0x84   :  { %v1710_v32 = vpop.permute.xlu1 %131  ;;  %v130_v33 = vpop.permute.xlu0 %129  ;;  %v407_v45 = vsel %vm405_vm4, %v88_v31, %v362_v37  ;;  %v1798_v37 = vrot.slane %v1672_v17, %v1740_v52 }
  0x85   :  { %v140_v35 = vsel %vm137_vm3, %v130_v33, %v1710_v32 }
  0x86   :  { %v164_v39 = vmul.f32 %v1707_v30, %v140_v35  ;;  %v1790_v35 = vrot.slane %v1689_v22, %v1740_v52 }
  0x88   :  { %v96_v42 = vpop.permute.xlu1 %95  ;;  %v58_v44 = vpop.permute.xlu0 %57  ;;  %v411_v46 = vsel %vm405_vm4, %v164_v39, %v374_v36  ;;  %v1794_v36 = vrot.slane %v1689_v22, %v1742_v53  ;;  %v1802_v39 = vrot.slane %v1672_v17, %v1742_v53 }
  0x89   :  { %v65_v47 = vsel %vm61_vm2, %v58_v44, %v52_v25  ;;  %v423_v48 = vpack.c.bf16 %v411_v46, %v407_v45  ;;  %v101_v5 = vsel %vm99_vm1, %v94_v11, %v96_v42  ;;  %v100_v14 = vsel %vm99_vm1, %v96_v42, %v98_v16  ;;  %v1435_v16 = vld [vmem:[%s2428_s1 + $0x5] ss:$8 sm:$0xf] }
  0x8a   :  { %v87_v54 = vmul.f32 %v1728_v43, %v65_v47  ;;  %v127_v13 = vmul.f32 %v1749_v61, %v101_v5  ;;  %v128_v28 = vmul.f32 %v1752_v62, %v100_v14  ;;  %v1805_v41 = vrot.slane %v1435_v16, %v1659_v12 }
  0x8b   :  { %451 = vmatprep.subr.bf16.mxu0 %v423_v48 }
  0x8c   :  { %v172_v55 = vpop.permute.xlu1 %171  ;;  %v136_v56 = vpop.permute.xlu0 %135  ;;  %v406_v20 = vsel %vm405_vm4, %v87_v54, %v361_v59  ;;  %v363_v40 = vrot.slane %v127_v13, 4  ;;  %v364_v22 = vrot.slane %v128_v28, 4 }
  0x8d   :  { %v141_v57 = vsel %vm137_vm3, %v136_v56, %v130_v33  ;;  %v176_v25 = vsel %vm175_vm0, %v172_v55, %v174_v15  ;;  %v177_v11 = vsel %vm175_vm0, %v1657_v10, %v172_v55  ;;  %v1785_v10 = vld [vmem:[%s2428_s1 + $0x7] ss:$8 sm:$0xf] }
  0x8e   :  { %v163_v60 = vmul.f32 %v1738_v51, %v141_v57  ;;  %v203_v29 = vmul.f32 %v1755_v63, %v177_v11  ;;  %v204_v31 = vmul.f32 %v1760_v6, %v176_v25  ;;  %v1810_v42 = vrot.slane %v1785_v10, %v1659_v12 }
  0x90   :  { %v1762_v7 = vpop.permute.xlu1 %209  ;;  %v208_v8 = vpop.permute.xlu0 %207  ;;  %v410_v21 = vsel %vm405_vm4, %v163_v60, %v373_v58  ;;  %v375_v45 = vrot.slane %v203_v29, 4  ;;  %v376_v46 = vrot.slane %v204_v31, 4  ;;  %v1848_v31 = vrot.slane %v1435_v16, %v1697_v26 }
  0x91   :  { %v422_v27 = vpack.c.bf16 %v410_v21, %v406_v20  ;;  %v215_v47 = vsel %vm213_vm5, %v208_v8, %v1762_v7 }
  0x93   :  { %452 = vmatpush1.bf16.msra.mxu0 %v422_v27 }
  0x94   :  { %v1780_v33 = vpop.permute.xlu1 %285  ;;  %v284_v15 = vpop.permute.xlu0 %283 }
  0x98   :  { %v134_v48 = vpop.permute.xlu1 %133  ;;  %v56_v17 = vpop.permute.xlu0 %55 }
  0x99   :  { %v138_v49 = vsel %vm137_vm3, %v134_v48, %v136_v56  ;;  %v139_v50 = vsel %vm137_vm3, %v1710_v32, %v134_v48  ;;  %v62_v54 = vsel %vm61_vm2, %v56_v17, %v58_v44  ;;  %v63_v55 = vsel %vm61_vm2, %v1691_v23, %v56_v17  ;;  %v1436_v23 = vld [vmem:[%s2428_s1 + $0x6] ss:$8 sm:$0xf] }
  0x9a   :  { %v165_v57 = vmul.f32 %v1790_v35, %v139_v50  ;;  %v166_v58 = vmul.f32 %v1794_v36, %v138_v49  ;;  %v89_v59 = vmul.f32 %v1798_v37, %v63_v55  ;;  %v90_v60 = vmul.f32 %v1802_v39, %v62_v54 }
  0x9b   :  { %v240_v56 = vmul.f32 %v1805_v41, %v215_v47  ;;  %v291_v32 = vsel %vm289_vm6, %v284_v15, %v1780_v33  ;;  %v1835_v44 = vrot.slane %v1785_v10, %v1697_v26  ;;  %v1860_v17 = vrot.slane %v1436_v23, %v1697_v26 }
  0x9c   :  { %v282_v5 = vpop.permute.xlu1 %281  ;;  %v206_v20 = vpop.permute.xlu0 %205  ;;  %v409_v21 = vsel %vm405_vm4, %v90_v60, %v364_v22  ;;  %v413_v14 = vsel %vm405_vm4, %v166_v58, %v376_v46  ;;  %v408_v25 = vsel %vm405_vm4, %v89_v59, %v363_v40  ;;  %v412_v11 = vsel %vm405_vm4, %v165_v57, %v375_v45 }
  0x9d   :  { %v292_v27 = vsel %vm289_vm6, %v282_v5, %v284_v15  ;;  %v425_v13 = vpack.c.bf16 %v413_v14, %v409_v21  ;;  %v424_v28 = vpack.c.bf16 %v412_v11, %v408_v25  ;;  %v316_v29 = vmul.f32 %v1810_v42, %v291_v32 }
  0x9e   :  { %v1852_v22 = vrot.slane %v1436_v23, %v1659_v12  ;;  %v216_v40 = vsel %vm213_vm5, %v206_v20, %v208_v8  ;;  %v386_v45 = vrot.slane %v240_v56, 4  ;;  %v315_v46 = vmul.f32 %v1835_v44, %v292_v27 }
  0x9f   :  { %492 = vmatprep.subr.bf16.mxu1 %v425_v13  ;;  %v1863_v49 = vrot.slane %v1435_v16, %v1740_v52  ;;  %v398_v50 = vrot.slane %v316_v29, 4  ;;  %v239_v54 = vmul.f32 %v1848_v31, %v216_v40  ;;  %v1868_v55 = vrot.slane %v1435_v16, %v1742_v53 }
  0xa0   :  { %v248_v15 = vpop.permute.xlu1 %247  ;;  %493 = vmatpush1.bf16.msra.mxu1 %v424_v28  ;;  %v246_v47 = vpop.permute.xlu0 %245  ;;  %v1872_v57 = vrot.slane %v1785_v10, %v1740_v52  ;;  %v397_v58 = vrot.slane %v315_v46, 4  ;;  %v415_v56 = vsel %vm405_vm4, %v1581_v1, %v386_v45  ;;  %v1879_v21 = vrot.slane %v1785_v10, %v1742_v53  ;;  %v1438_v1 = vld [vmem:[%s2428_s1 + $0x20] ss:$8 sm:$0xf] }
  0xa1   :  { %v253_v48 = vsel %vm251_vm7, %v246_v47, %v248_v15  ;;  %v385_v27 = vrot.slane %v239_v54, 4  ;;  %v1895_v29 = vrot.slane %v1436_v23, %v1740_v52 }
  0xa2   :  { %v278_v8 = vmul.f32 %v1852_v22, %v253_v48 }
  0xa4   :  { %v244_v59 = vpop.permute.xlu1 %243  ;;  %v212_v60 = vpop.permute.xlu0 %211  ;;  %v419_v32 = vsel %vm405_vm4, %v278_v8, %v398_v50 }
  0xa5   :  { %v254_v16 = vsel %vm251_vm7, %v244_v59, %v246_v47  ;;  %v214_v14 = vsel %vm213_vm5, %v1762_v7, %v212_v60  ;;  %v217_v25 = vsel %vm213_vm5, %v212_v60, %v206_v20  ;;  %v427_v11 = vpack.c.bf16 %v419_v32, %v415_v56 }
  0xa6   :  { %v277_v13 = vmul.f32 %v1860_v17, %v254_v16  ;;  %v241_v10 = vmul.f32 %v1863_v49, %v214_v14  ;;  %v242_v28 = vmul.f32 %v1868_v55, %v217_v25  ;;  %v1898_v7 = vrot.slane %v1436_v23, %v1742_v53 }
  0xa7   :  { %453 = vmatprep.subr.bf16.mxu0 %v427_v11  ;;  %v1903_v47 = vrot.slane %v1438_v1, %v1697_v26  ;;  %v414_v26 = vsel %vm405_vm4, %v1573_v0, %v385_v27  ;;  %v1926_v11 = vrot.slane %v1438_v1, %v1659_v12  ;;  %v1929_v0 = vrot.slane %v1438_v1, %v1740_v52 }
  0xa8   :  { %v388_v20 = vrot.slane %v242_v28, 4  ;;  %v250_v40 = vpop.permute.xlu1 %249  ;;  %v288_v45 = vpop.permute.xlu0 %287  ;;  %v418_v46 = vsel %vm405_vm4, %v277_v13, %v397_v58  ;;  %v387_v8 = vrot.slane %v241_v10, 4 }
  0xa9   :  { %v252_v48 = vsel %vm251_vm7, %v248_v15, %v250_v40  ;;  %v255_v50 = vsel %vm251_vm7, %v250_v40, %v244_v59  ;;  %v290_v23 = vsel %vm289_vm6, %v1780_v33, %v288_v45  ;;  %v293_v54 = vsel %vm289_vm6, %v288_v45, %v282_v5 }
  0xaa   :  { %v317_v58 = vmul.f32 %v1872_v57, %v290_v23  ;;  %v318_v60 = vmul.f32 %v1879_v21, %v293_v54  ;;  %v426_v56 = vpack.c.bf16 %v418_v46, %v414_v26  ;;  %v1919_v15 = vrot.slane %v1438_v1, %v1742_v53  ;;  %v42_v26 = vld [vmem:[%s2429_s2] sm:$0xf] }
  0xab   :  { %v279_v59 = vmul.f32 %v1895_v29, %v252_v48  ;;  %v280_v32 = vmul.f32 %v1898_v7, %v255_v50  ;;  %v417_v53 = vsel %vm405_vm4, %v1594_v3, %v388_v20  ;;  %v416_v10 = vsel %vm405_vm4, %v1586_v2, %v387_v8 }
  0xac   :  { %v399_v33 = vrot.slane %v317_v58, 4  ;;  %v400_v16 = vrot.slane %v318_v60, 4  ;;  %v322_v14 = vpop.permute.xlu1 %321  ;;  %v320_v5 = vpop.permute.xlu0 %319  ;;  %454 = vmatpush1.bf16.msra.mxu0 %v426_v56 }
  0xad   :  { %v330_v25 = vsel %vm327_vm8, %v320_v5, %v322_v14 }
  0xae   :  { %v353_v27 = vmul.f32 %v1903_v47, %v330_v25  ;;  %v421_v13 = vsel %vm405_vm4, %v280_v32, %v400_v16  ;;  %v420_v28 = vsel %vm405_vm4, %v279_v59, %v399_v33 }
  0xaf   :  { %v429_v40 = vpack.c.bf16 %v421_v13, %v417_v53  ;;  %v428_v45 = vpack.c.bf16 %v420_v28, %v416_v10 }
  0xb0   :  { %v326_v46 = vpop.permute.xlu1 %325  ;;  %v324_v12 = vpop.permute.xlu0 %323  ;;  %v430_v20 = vpack.c.bf16 %v353_v27, %v353_v27 }
  0xb1   :  { %v331_v52 = vsel %vm327_vm8, %v326_v46, %v320_v5  ;;  %v328_v1 = vsel %vm327_vm8, %v324_v12, %v326_v46  ;;  %v329_v3 = vsel %vm327_vm8, %v322_v14, %v324_v12  ;;  %494 = vmatprep.subr.bf16.mxu1 %v429_v40 }
  0xb2   :  { %v356_v48 = vmul.f32 %v1919_v15, %v331_v52  ;;  %v354_v2 = vmul.f32 %v1926_v11, %v329_v3  ;;  %v355_v50 = vmul.f32 %v1929_v0, %v328_v1  ;;  %495 = vmatpush1.bf16.msra.mxu1 %v428_v45  ;;  %v440_v58 = vsel %vm438_vm9, %v430_v20, 0 }
  0xb4   :  { %v433_v23 = vpack.c.bf16 %v356_v48, %v356_v48  ;;  %v431_v54 = vpack.c.bf16 %v354_v2, %v354_v2  ;;  %v432_v8 = vpack.c.bf16 %v355_v50, %v355_v50 }
  0xb6   :  { %1439 = vmatprep.subr.msk.bf16.mxu0 %vm438_vm9, %v431_v54  ;;  %1441 = vmatprep.subr.msk.bf16.mxu1 %vm438_vm9, %v433_v23  ;;  %v446_v60 = vsel %vm438_vm9, %v432_v8, 0  ;;  %v1521_v8 = vmov 1  }
  0xb7   :  { %456 = vmatpush1.bf16.msra.mxu0 %v440_v58  ;;  %497 = vmatpush1.bf16.msra.mxu1 %v446_v60  ;;  %v1956_v58 = vld [vmem:[%s2430_s6] sm:$0xff] }
  0xb8   :  { %1483 = vset.pattern.permute.xlu0 %v1521_v8 }
  0xba   :  { %1440 = vmatmul.mubr.msk.bf16.vlgmr.msra.gmra.mrb[0].mxu0 %vm434_vm10, %v42_v26  ;;  %1442 = vmatmul.mubr.msk.bf16.vlgmr.msra.gmra.mrb[0].mxu1 %vm434_vm10, %v42_v26 }
  0xbb   :  { %781 = vmatprep.mubr.bf16.mxu0 %v2436_v4  ;;  %822 = vmatprep.mubr.bf16.mxu1 %v2436_v4 }
 0x18d   :  { %v485_v56 = vpop.f32.mrb[0].mxu0  ;;  %v526_v59 = vpop.f32.mrb[0].mxu1 }
 0x18e   :  { %v539_v32 = vmul.f32 %v485_v56, %v485_v56  ;;  %v487_v33 = vpop.f32.mrb[1].mxu0  ;;  %v528_v16 = vpop.f32.mrb[1].mxu1  ;;  %v541_v14 = vmul.f32 %v526_v59, %v526_v59 }
 0x18f   :  { %v534_v5 = vadd.f32 %v487_v33, %v485_v56  ;;  %v540_v25 = vmul.f32 %v487_v33, %v487_v33  ;;  %v489_v53 = vpop.f32.mrb[2].mxu0  ;;  %v530_v27 = vpop.f32.mrb[2].mxu1  ;;  %v542_v46 = vmul.f32 %v528_v16, %v528_v16 }
 0x190   :  { %v490_v13 = vpop.f32.mrb[3].mxu0  ;;  %v531_v10 = vpop.f32.mrb[3].mxu1 }
 0x191   :  { %v535_v28 = vadd.f32 %v534_v5, %v526_v59  ;;  %v543_v40 = vadd.f32 %v540_v25, %v539_v32 }
 0x193   :  { %v536_v45 = vadd.f32 %v535_v28, %v528_v16  ;;  %v544_v12 = vadd.f32 %v543_v40, %v541_v14 }
 0x195   :  { %537 = vadd.xlane.f32.xlu0 %v536_v45  ;;  %v545_v52 = vadd.f32 %v544_v12, %v542_v46 }
 0x197   :  { %546 = vadd.xlane.f32.xlu1 %v545_v52 }
 0x222   :  { %v538_v1 = vpop.xlane.xlu0 %537 }
 0x223   :  { %v548_v3 = vmul.f32 0.001953125, %v538_v1 }
 0x224   :  { %v547_v20 = vpop.xlane.xlu1 %546 }
 0x225   :  { %v550_v48 = vmul.f32 %v548_v3, %v548_v3  ;;  %v549_v2 = vmul.f32 0.001953125, %v547_v20 }
 0x227   :  { %v551_v50 = vsub.f32 %v549_v2, %v550_v48 }
 0x229   :  { %v552_v23 = vmax.f32 %v551_v50, 0.0 }
 0x22b   :  { %v553_v54 = vadd.f32 1e-05, %v552_v23 }
 0x22d   :  { %1503 = vrsqrt.f32 %v553_v54 }
 0x237   :  { %v1504_v60 = vpop.eup %1503 }
 0x238   :  { %v555_v26 = vmul.f32 %v1504_v60, %v1956_v58 }
 0x23a   :  { %564 = vperm.xlu1 %1482, %v555_v26   ;;  %v556_v32 = vmul.f32 %v555_v26, %v548_v3 }
 0x23c   :  { %558 = vrot.lane.b32.xlu0 %v556_v32, %s1512_s26 }
 0x2ae   :  { %v559_v14 = vpop.permute.xlu0 %558 }
 0x2af   :  { %v561_v5 = vsub.f32 %v1956_v58, %v559_v14 }
 0x2b1   :  { %573 = vperm.xlu0 %1483, %v561_v5  }
 0x2b9   :  { %v565_v25 = vpop.permute.xlu1 %564 }
 0x2ba   :  { %v567_v53 = vmul.f32 %v565_v25, %v485_v56  ;;  %v568_v13 = vmul.f32 %v565_v25, %v487_v33  ;;  %v570_v10 = vmul.f32 %v565_v25, %v528_v16  ;;  %v569_v12 = vmul.f32 %v565_v25, %v526_v59 }
 0x330   :  { %v574_v27 = vpop.permute.xlu0 %573 }
 0x331   :  { %v576_v28 = vadd.f32 %v574_v27, %v567_v53  ;;  %v577_v40 = vadd.f32 %v574_v27, %v568_v13  ;;  %v579_v45 = vadd.f32 %v574_v27, %v570_v10  ;;  %v578_v52 = vadd.f32 %v574_v27, %v569_v12 }
 0x333   :  { %v1961_v46 = vmax.f32 %v576_v28, 0.0  ;;  %v1967_v1 = vmax.f32 %v577_v40, 0.0  ;;  %v1969_v3 = vmax.f32 %v579_v45, 0.0  ;;  %v1975_v56 = vmax.f32 %v578_v52, 0.0 }
 0x335   :  { %601 = vrot.lane.b32.xlu0 %v1961_v46, %s1513_s27  ;;  %585 = vrot.lane.b32.xlu1 %v1961_v46, %s1514_s30 }
 0x339   :  { %591 = vrot.lane.b32.xlu0 %v1969_v3, %s1514_s30  ;;  %587 = vrot.lane.b32.xlu1 %v1967_v1, %s1514_s30 }
 0x33d   :  { %589 = vrot.lane.b32.xlu0 %v1975_v56, %s1514_s30  ;;  %603 = vrot.lane.b32.xlu1 %v1967_v1, %s1513_s27 }
 0x341   :  { %617 = vrot.lane.b32.xlu0 %v1961_v46, %s1515_s0  ;;  %607 = vrot.lane.b32.xlu1 %v1969_v3, %s1513_s27 }
 0x345   :  { %633 = vrot.lane.b32.xlu0 %v1961_v46, %s1512_s26  ;;  %605 = vrot.lane.b32.xlu1 %v1975_v56, %s1513_s27 }
 0x349   :  { %623 = vrot.lane.b32.xlu0 %v1969_v3, %s1515_s0  ;;  %619 = vrot.lane.b32.xlu1 %v1967_v1, %s1515_s0 }
 0x34d   :  { %621 = vrot.lane.b32.xlu0 %v1975_v56, %s1515_s0  ;;  %635 = vrot.lane.b32.xlu1 %v1967_v1, %s1512_s26 }
 0x351   :  { %651 = vrot.lane.b32.xlu0 %v1967_v1, %s1516_s8  ;;  %639 = vrot.lane.b32.xlu1 %v1969_v3, %s1512_s26 }
 0x355   :  { %649 = vrot.lane.b32.xlu0 %v1961_v46, %s1516_s8  ;;  %637 = vrot.lane.b32.xlu1 %v1975_v56, %s1512_s26 }
 0x359   :  { %667 = vrot.lane.b32.xlu0 %v1967_v1, %s1518_s10  ;;  %653 = vrot.lane.b32.xlu1 %v1975_v56, %s1516_s8 }
 0x35d   :  { %683 = vrot.lane.b32.xlu0 %v1967_v1, %s1517_s9  ;;  %655 = vrot.lane.b32.xlu1 %v1969_v3, %s1516_s8 }
 0x361   :  { %665 = vrot.lane.b32.xlu0 %v1961_v46, %s1518_s10  ;;  %669 = vrot.lane.b32.xlu1 %v1975_v56, %s1518_s10 }
 0x365   :  { %671 = vrot.lane.b32.xlu0 %v1969_v3, %s1518_s10  ;;  %685 = vrot.lane.b32.xlu1 %v1975_v56, %s1517_s9 }
 0x369   :  { %697 = vrot.lane.b32.xlu0 %v1961_v46, %s1520_s11  ;;  %681 = vrot.lane.b32.xlu1 %v1961_v46, %s1517_s9 }
 0x36d   :  { %701 = vrot.lane.b32.xlu0 %v1975_v56, %s1520_s11  ;;  %687 = vrot.lane.b32.xlu1 %v1969_v3, %s1517_s9 }
 0x371   :  { %699 = vrot.lane.b32.xlu1 %v1967_v1, %s1520_s11 }
 0x375   :  { %703 = vrot.lane.b32.xlu1 %v1969_v3, %s1520_s11 }
 0x3a7   :  { %v602_v59 = vpop.permute.xlu0 %601  ;;  %v586_v33 = vpop.permute.xlu1 %585 }
 0x3ab   :  { %v592_v16 = vpop.permute.xlu0 %591  ;;  %v588_v20 = vpop.permute.xlu1 %587 }
 0x3ac   :  { %v595_v48 = vsel %vm61_vm2, %v586_v33, %v588_v20  ;;  %v596_v26 = vsel %vm61_vm2, %v592_v16, %v586_v33 }
 0x3ad   :  { %v598_v54 = vmul.f32 %v595_v48, %v1695_v24  ;;  %v597_v53 = vmul.f32 %v596_v26, %v1728_v43 }
 0x3af   :  { %v590_v2 = vpop.permute.xlu0 %589  ;;  %v604_v50 = vpop.permute.xlu1 %603 }
 0x3b0   :  { %v611_v23 = vsel %vm99_vm1, %v602_v59, %v604_v50  ;;  %v593_v13 = vsel %vm61_vm2, %v590_v2, %v592_v16  ;;  %v594_v10 = vsel %vm61_vm2, %v588_v20, %v590_v2 }
 0x3b1   :  { %v614_v60 = vmul.f32 %v611_v23, %v1678_v19  ;;  %v600_v33 = vmul.f32 %v593_v13, %v1802_v39 }
 0x3b3   :  { %v618_v32 = vpop.permute.xlu0 %617  ;;  %v608_v14 = vpop.permute.xlu1 %607  ;;  %v714_v5 = vpack.c.bf16 %v614_v60, %v598_v54 }
 0x3b4   :  { %v612_v25 = vsel %vm99_vm1, %v608_v14, %v602_v59  ;;  %v599_v59 = vmul.f32 %v594_v10, %v1798_v37 }
 0x3b5   :  { %v613_v27 = vmul.f32 %v612_v25, %v1719_v38  ;;  %749 = vmatprep.subr.bf16.mxu0 %v714_v5 }
 0x3b7   :  { %v713_v28 = vpack.c.bf16 %v613_v27, %v597_v53  ;;  %v634_v40 = vpop.permute.xlu0 %633  ;;  %v606_v45 = vpop.permute.xlu1 %605 }
 0x3b8   :  { %v609_v12 = vsel %vm99_vm1, %v606_v45, %v608_v14  ;;  %v610_v52 = vsel %vm99_vm1, %v604_v50, %v606_v45 }
 0x3b9   :  { %v615_v48 = vmul.f32 %v610_v52, %v1749_v61  ;;  %v616_v16 = vmul.f32 %v609_v12, %v1752_v62  ;;  %750 = vmatpush1.bf16.msra.mxu0 %v713_v28 }
 0x3bb   :  { %v715_v23 = vpack.c.bf16 %v615_v48, %v599_v59  ;;  %v624_v20 = vpop.permute.xlu0 %623  ;;  %v620_v2 = vpop.permute.xlu1 %619  ;;  %v716_v54 = vpack.c.bf16 %v616_v16, %v600_v33 }
 0x3bc   :  { %v627_v60 = vsel %vm137_vm3, %v618_v32, %v620_v2  ;;  %v628_v53 = vsel %vm137_vm3, %v624_v20, %v618_v32 }
 0x3bd   :  { %790 = vmatprep.subr.bf16.mxu1 %v716_v54  ;;  %v630_v5 = vmul.f32 %v627_v60, %v1707_v30  ;;  %v629_v45 = vmul.f32 %v628_v53, %v1738_v51 }
 0x3be   :  { %791 = vmatpush1.bf16.msra.mxu1 %v715_v23 }
 0x3bf   :  { %v622_v26 = vpop.permute.xlu0 %621  ;;  %v636_v50 = vpop.permute.xlu1 %635 }
 0x3c0   :  { %v643_v14 = vsel %vm175_vm0, %v634_v40, %v636_v50  ;;  %v626_v12 = vsel %vm137_vm3, %v620_v2, %v622_v26  ;;  %v625_v59 = vsel %vm137_vm3, %v622_v26, %v624_v20 }
 0x3c1   :  { %v646_v25 = vmul.f32 %v643_v14, %v1675_v18  ;;  %v631_v16 = vmul.f32 %v626_v12, %v1790_v35  ;;  %v632_v54 = vmul.f32 %v625_v59, %v1794_v36 }
 0x3c3   :  { %v652_v27 = vpop.permute.xlu0 %651  ;;  %v640_v13 = vpop.permute.xlu1 %639  ;;  %v718_v10 = vpack.c.bf16 %v646_v25, %v630_v5 }
 0x3c4   :  { %v644_v28 = vsel %vm175_vm0, %v640_v13, %v634_v40 }
 0x3c5   :  { %v645_v52 = vmul.f32 %v644_v28, %v1713_v34  ;;  %751 = vmatprep.subr.bf16.mxu0 %v718_v10 }
 0x3c7   :  { %v717_v33 = vpack.c.bf16 %v645_v52, %v629_v45  ;;  %v650_v48 = vpop.permute.xlu0 %649  ;;  %v638_v32 = vpop.permute.xlu1 %637 }
 0x3c8   :  { %v641_v23 = vsel %vm175_vm0, %v638_v32, %v640_v13  ;;  %v642_v40 = vsel %vm175_vm0, %v636_v50, %v638_v32  ;;  %v659_v2 = vsel %vm213_vm5, %v650_v48, %v652_v27 }
 0x3c9   :  { %v647_v60 = vmul.f32 %v642_v40, %v1755_v63  ;;  %v648_v20 = vmul.f32 %v641_v23, %v1760_v6  ;;  %752 = vmatpush1.bf16.msra.mxu0 %v717_v33  ;;  %v661_v53 = vmul.f32 %v659_v2, %v1848_v31 }
 0x3cb   :  { %v719_v26 = vpack.c.bf16 %v647_v60, %v631_v16  ;;  %v668_v14 = vpop.permute.xlu0 %667  ;;  %v654_v5 = vpop.permute.xlu1 %653  ;;  %v720_v25 = vpack.c.bf16 %v648_v20, %v632_v54  ;;  %v721_v12 = vpack.c.bf16 %v661_v53, %v1961_v46 }
 0x3cc   :  { %v658_v13 = vsel %vm213_vm5, %v652_v27, %v654_v5 }
 0x3cd   :  { %v662_v50 = vmul.f32 %v658_v13, %v1805_v41  ;;  %792 = vmatprep.subr.bf16.mxu1 %v720_v25 }
 0x3ce   :  { %793 = vmatpush1.bf16.msra.mxu1 %v719_v26 }
 0x3cf   :  { %v684_v10 = vpop.permute.xlu0 %683  ;;  %v656_v28 = vpop.permute.xlu1 %655  ;;  %v722_v45 = vpack.c.bf16 %v662_v50, %v1967_v1 }
 0x3d0   :  { %v657_v52 = vsel %vm213_vm5, %v654_v5, %v656_v28  ;;  %v660_v59 = vsel %vm213_vm5, %v656_v28, %v650_v48 }
 0x3d1   :  { %v663_v33 = vmul.f32 %v657_v52, %v1863_v49  ;;  %v664_v27 = vmul.f32 %v660_v59, %v1868_v55  ;;  %753 = vmatprep.subr.bf16.mxu0 %v722_v45 }
 0x3d2   :  { %754 = vmatpush1.bf16.msra.mxu0 %v721_v12 }
 0x3d3   :  { %v723_v32 = vpack.c.bf16 %v663_v33, %v1975_v56  ;;  %v666_v16 = vpop.permute.xlu0 %665  ;;  %v670_v23 = vpop.permute.xlu1 %669  ;;  %v724_v1 = vpack.c.bf16 %v664_v27, %v1969_v3 }
 0x3d4   :  { %v674_v46 = vsel %vm251_vm7, %v668_v14, %v670_v23  ;;  %v675_v56 = vsel %vm251_vm7, %v666_v16, %v668_v14 }
 0x3d5   :  { %794 = vmatprep.subr.bf16.mxu1 %v724_v1  ;;  %v678_v2 = vmul.f32 %v674_v46, %v1852_v22  ;;  %v677_v5 = vmul.f32 %v675_v56, %v1860_v17 }
 0x3d6   :  { %795 = vmatpush1.bf16.msra.mxu1 %v723_v32 }
 0x3d7   :  { %v672_v40 = vpop.permute.xlu0 %671  ;;  %v686_v54 = vpop.permute.xlu1 %685 }
 0x3d8   :  { %v690_v48 = vsel %vm289_vm6, %v684_v10, %v686_v54  ;;  %v673_v13 = vsel %vm251_vm7, %v670_v23, %v672_v40  ;;  %v676_v50 = vsel %vm251_vm7, %v672_v40, %v666_v16 }
 0x3d9   :  { %v694_v60 = vmul.f32 %v690_v48, %v1810_v42  ;;  %v679_v12 = vmul.f32 %v673_v13, %v1895_v29  ;;  %v680_v52 = vmul.f32 %v676_v50, %v1898_v7 }
 0x3db   :  { %v682_v20 = vpop.permute.xlu1 %681  ;;  %v726_v26 = vpack.c.bf16 %v694_v60, %v678_v2  ;;  %v698_v25 = vpop.permute.xlu0 %697 }
 0x3dc   :  { %v691_v3 = vsel %vm289_vm6, %v682_v20, %v684_v10 }
 0x3dd   :  { %v693_v53 = vmul.f32 %v691_v3, %v1835_v44  ;;  %755 = vmatprep.subr.bf16.mxu0 %v726_v26 }
 0x3df   :  { %v725_v28 = vpack.c.bf16 %v693_v53, %v677_v5  ;;  %v688_v45 = vpop.permute.xlu1 %687  ;;  %v702_v27 = vpop.permute.xlu0 %701  ;;  %v584_v53 = vld [vmem:[%s2431_s3] sm:$0xf] }
 0x3e0   :  { %v689_v14 = vsel %vm289_vm6, %v686_v54, %v688_v45  ;;  %v692_v10 = vsel %vm289_vm6, %v688_v45, %v682_v20 }
 0x3e1   :  { %v695_v59 = vmul.f32 %v689_v14, %v1872_v57  ;;  %v696_v33 = vmul.f32 %v692_v10, %v1879_v21  ;;  %756 = vmatpush1.bf16.msra.mxu0 %v725_v28 }
 0x3e3   :  { %v727_v32 = vpack.c.bf16 %v695_v59, %v679_v12  ;;  %v700_v16 = vpop.permute.xlu1 %699  ;;  %v728_v23 = vpack.c.bf16 %v696_v33, %v680_v52 }
 0x3e4   :  { %v706_v1 = vsel %vm327_vm8, %v700_v16, %v702_v27  ;;  %v707_v46 = vsel %vm327_vm8, %v698_v25, %v700_v16 }
 0x3e5   :  { %v709_v40 = vmul.f32 %v707_v46, %v1903_v47  ;;  %v710_v54 = vmul.f32 %v706_v1, %v1926_v11  ;;  %796 = vmatprep.subr.bf16.mxu1 %v728_v23 }
 0x3e6   :  { %797 = vmatpush1.bf16.msra.mxu1 %v727_v32 }
 0x3e7   :  { %v729_v48 = vpack.c.bf16 %v709_v40, %v709_v40  ;;  %v730_v2 = vpack.c.bf16 %v710_v54, %v710_v54  ;;  %v704_v60 = vpop.permute.xlu1 %703 }
 0x3e8   :  { %v705_v56 = vsel %vm327_vm8, %v702_v27, %v704_v60  ;;  %v708_v20 = vsel %vm327_vm8, %v704_v60, %v698_v25  ;;  %v1522_v60 = vmov 2  }
 0x3e9   :  { %v711_v26 = vmul.f32 %v705_v56, %v1929_v0  ;;  %v712_v3 = vmul.f32 %v708_v20, %v1919_v15  ;;  %1443 = vmatprep.subr.msk.bf16.mxu0 %vm405_vm4, %v730_v2  ;;  %v738_v5 = vsel %vm405_vm4, %v729_v48, 0  ;;  %1484 = vset.pattern.permute.xlu1 %v1522_v60 }
 0x3ea   :  { %758 = vmatpush1.bf16.msra.mxu0 %v738_v5 }
 0x3eb   :  { %v731_v13 = vpack.c.bf16 %v711_v26, %v711_v26  ;;  %v732_v50 = vpack.c.bf16 %v712_v3, %v712_v3 }
 0x3ed   :  { %1444 = vmatmul.mubr.msk.bf16.vlgmr.msra.gmra.mrb[4].mxu0 %vm733_vm11, %v584_v53  ;;  %1445 = vmatprep.subr.msk.bf16.mxu1 %vm405_vm4, %v732_v50  ;;  %v744_v25 = vsel %vm405_vm4, %v731_v13, 0 }
 0x3ee   :  { %799 = vmatpush1.bf16.msra.mxu1 %v744_v25  ;;  %1227 = vmatprep.mubr.bf16.mxu0 %v2436_v4  ;;  %v1523_v25 = vmov 3  }
 0x3ef   :  { %1487 = vset.pattern.permute.xlu0 %v1523_v25 }
 0x3f1   :  { %1446 = vmatmul.mubr.msk.bf16.vlgmr.msra.gmra.mrb[4].mxu1 %vm733_vm11, %v584_v53 }
 0x3f2   :  { %1268 = vmatprep.mubr.bf16.mxu1 %v2436_v4 }
 0x4c0   :  { %v2142_v28 = vpop.f32.mrb[4].mxu0 }
 0x4c1   :  { %v836_v45 = vmul.f32 %v2142_v28, %v2142_v28  ;;  %v2146_v14 = vpop.f32.mrb[5].mxu0 }
 0x4c2   :  { %v831_v10 = vadd.f32 %v2146_v14, %v2142_v28  ;;  %v837_v12 = vmul.f32 %v2146_v14, %v2146_v14  ;;  %v787_v52 = vpop.f32.mrb[6].mxu0 }
 0x4c3   :  { %v788_v59 = vpop.f32.mrb[7].mxu0  ;;  %v881_v52 = vld [vmem:[%s2432_s4] sm:$0xff] }
 0x4c4   :  { %v2152_v33 = vpop.f32.mrb[4].mxu1  ;;  %v840_v27 = vadd.f32 %v837_v12, %v836_v45  ;;  %v1524_v59 = vmov 4  }
 0x4c5   :  { %v838_v32 = vmul.f32 %v2152_v33, %v2152_v33  ;;  %v826_v16 = vpop.f32.mrb[5].mxu1  ;;  %v832_v23 = vadd.f32 %v831_v10, %v2152_v33 }
 0x4c6   :  { %v828_v1 = vpop.f32.mrb[6].mxu1  ;;  %v839_v46 = vmul.f32 %v826_v16, %v826_v16 }
 0x4c7   :  { %v829_v40 = vpop.f32.mrb[7].mxu1  ;;  %v833_v54 = vadd.f32 %v832_v23, %v826_v16  ;;  %v841_v48 = vadd.f32 %v840_v27, %v838_v32  ;;  %v2439_v23 = vmov 5   ;;  %v2438_v1 = vmov 6  }
 0x4c8   :  { %v1528_v40 = vmov 8  }
 0x4c9   :  { %834 = vadd.xlane.f32.xlu0 %v833_v54  ;;  %v842_v2 = vadd.f32 %v841_v48, %v839_v46  ;;  %v2435_v46 = vmov 7  }
 0x4cb   :  { %843 = vadd.xlane.f32.xlu1 %v842_v2 }
 0x556   :  { %v835_v56 = vpop.xlane.xlu0 %834 }
 0x557   :  { %v845_v20 = vmul.f32 0.001953125, %v835_v56 }
 0x558   :  { %v844_v26 = vpop.xlane.xlu1 %843 }
 0x559   :  { %v847_v3 = vmul.f32 %v845_v20, %v845_v20  ;;  %v846_v5 = vmul.f32 0.001953125, %v844_v26 }
 0x55b   :  { %v848_v53 = vsub.f32 %v846_v5, %v847_v3 }
 0x55d   :  { %v849_v13 = vmax.f32 %v848_v53, 0.0 }
 0x55f   :  { %v850_v50 = vadd.f32 1e-05, %v849_v13 }
 0x561   :  { %1505 = vrsqrt.f32 %v850_v50 }
 0x56b   :  { %v1506_v45 = vpop.eup %1505 }
 0x56c   :  { %v852_v10 = vmul.f32 %v1506_v45, %v1956_v58 }
 0x56e   :  { %861 = vperm.xlu1 %1484, %v852_v10   ;;  %v853_v12 = vmul.f32 %v852_v10, %v845_v20 }
 0x570   :  { %855 = vrot.lane.b32.xlu0 %v853_v12, %s1512_s26 }
 0x572   :  { %1485 = vset.pattern.permute.xlu1 %v1524_v59 }
 0x573   :  { %884 = vperm.xlu1 %1485, %v881_v52  }
 0x577   :  { %1486 = vset.pattern.permute.xlu1 %v2436_v4 }
 0x578   :  { %908 = vperm.xlu1 %1486, %v881_v52  }
 0x57c   :  { %1489 = vset.pattern.permute.xlu1 %v1522_v60 }
 0x57d   :  { %964 = vperm.xlu1 %1489, %v881_v52  }
 0x581   :  { %1495 = vset.pattern.permute.xlu1 %v1524_v59 }
 0x5e2   :  { %v856_v27 = vpop.permute.xlu0 %855 }
 0x5e3   :  { %v858_v32 = vsub.f32 %v1956_v58, %v856_v27 }
 0x5e5   :  { %870 = vperm.xlu0 %1487, %v858_v32  }
 0x5e9   :  { %1488 = vset.pattern.permute.xlu0 %v1521_v8 }
 0x5ea   :  { %936 = vperm.xlu0 %1488, %v881_v52  }
 0x5ed   :  { %v862_v8 = vpop.permute.xlu1 %861 }
 0x5ee   :  { %1490 = vset.pattern.permute.xlu0 %v1523_v25  ;;  %v864_v54 = vmul.f32 %v862_v8, %v2142_v28  ;;  %v865_v48 = vmul.f32 %v862_v8, %v2146_v14  ;;  %v867_v2 = vmul.f32 %v862_v8, %v826_v16  ;;  %v866_v56 = vmul.f32 %v862_v8, %v2152_v33 }
 0x5ef   :  { %992 = vperm.xlu0 %1490, %v881_v52  }
 0x5f2   :  { %v2172_v5 = vpop.permute.xlu1 %884 }
 0x5f3   :  { %1491 = vset.pattern.permute.xlu0 %v2439_v23 }
 0x5f4   :  { %1020 = vperm.xlu0 %1491, %v881_v52  }
 0x5f8   :  { %1492 = vset.pattern.permute.xlu0 %v2438_v1 }
 0x5f9   :  { %1048 = vperm.xlu0 %1492, %v881_v52  }
 0x5fd   :  { %1493 = vset.pattern.permute.xlu0 %v2435_v46 }
 0x5fe   :  { %1076 = vperm.xlu0 %1493, %v881_v52  }
 0x602   :  { %1494 = vset.pattern.permute.xlu0 %v1528_v40 }
 0x603   :  { %1104 = vperm.xlu0 %1494, %v881_v52   ;;  %v909_v52 = vpop.permute.xlu1 %908 }
 0x607   :  { %1499 = vset.pattern.permute.xlu0 %v2435_v46  ;;  %v965_v27 = vpop.permute.xlu1 %964 }
 0x664   :  { %v871_v60 = vpop.permute.xlu0 %870 }
 0x665   :  { %v873_v20 = vadd.f32 %v871_v60, %v864_v54  ;;  %v874_v26 = vadd.f32 %v871_v60, %v865_v48  ;;  %v876_v3 = vadd.f32 %v871_v60, %v867_v2  ;;  %v875_v53 = vadd.f32 %v871_v60, %v866_v56 }
 0x667   :  { %v2174_v13 = vmax.f32 %v873_v20, 0.0  ;;  %v2176_v50 = vmax.f32 %v874_v26, 0.0  ;;  %v2178_v25 = vmax.f32 %v876_v3, 0.0  ;;  %v2186_v14 = vmax.f32 %v875_v53, 0.0 }
 0x669   :  { %2442 = vst [vmem:[#allocation2_spill] sm:$0xff] %v2174_v13  ;;  %2443 = vst [vmem:[#allocation3_spill] sm:$0xff] %v2176_v50  ;;  %v888_v28 = vmul.f32 %v2172_v5, %v2176_v50  ;;  %897 = vrot.lane.b32.xlu0 %v2178_v25, %s1514_s30  ;;  %891 = vrot.lane.b32.xlu1 %v2174_v13, %s1514_s30  ;;  %v937_v33 = vpop.permute.xlu0 %936  ;;  %v887_v2 = vmul.f32 %v2172_v5, %v2174_v13 }
 0x66d   :  { %895 = vrot.lane.b32.xlu0 %v2186_v14, %s1514_s30  ;;  %893 = vrot.lane.b32.xlu1 %v2176_v50, %s1514_s30  ;;  %s1529_s30 = smov 120  }
 0x66e   :  { %v2248_v16 = vpop.permute.xlu0 %992 }
 0x671   :  { %921 = vrot.lane.b32.xlu0 %v2176_v50, %s1513_s27  ;;  %919 = vrot.lane.b32.xlu1 %v2174_v13, %s1513_s27 }
 0x673   :  { %v2250_v45 = vpop.permute.xlu0 %1020 }
 0x675   :  { %949 = vrot.lane.b32.xlu0 %v2176_v50, %s1515_s0  ;;  %925 = vrot.lane.b32.xlu1 %v2178_v25, %s1513_s27 }
 0x678   :  { %v2252_v10 = vpop.permute.xlu0 %1048 }
 0x679   :  { %977 = vrot.lane.b32.xlu0 %v2176_v50, %s1512_s26  ;;  %923 = vrot.lane.b32.xlu1 %v2186_v14, %s1513_s27 }
 0x67d   :  { %1005 = vrot.lane.b32.xlu0 %v2176_v50, %s1516_s8  ;;  %947 = vrot.lane.b32.xlu1 %v2174_v13, %s1515_s0  ;;  %v2254_v12 = vpop.permute.xlu0 %1076 }
 0x681   :  { %1033 = vrot.lane.b32.xlu0 %v2176_v50, %s1518_s10  ;;  %953 = vrot.lane.b32.xlu1 %v2178_v25, %s1515_s0 }
 0x682   :  { %v2256_v59 = vpop.permute.xlu0 %1104 }
 0x685   :  { %1061 = vrot.lane.b32.xlu0 %v2176_v50, %s1517_s9  ;;  %951 = vrot.lane.b32.xlu1 %v2186_v14, %s1515_s0 }
 0x689   :  { %1065 = vrot.lane.b32.xlu0 %v2178_v25, %s1517_s9  ;;  %975 = vrot.lane.b32.xlu1 %v2174_v13, %s1512_s26 }
 0x68d   :  { %1089 = vrot.lane.b32.xlu0 %v2176_v50, %s1520_s11  ;;  %981 = vrot.lane.b32.xlu1 %v2178_v25, %s1512_s26 }
 0x691   :  { %1093 = vrot.lane.b32.xlu0 %v2178_v25, %s1520_s11  ;;  %979 = vrot.lane.b32.xlu1 %v2186_v14, %s1512_s26 }
 0x695   :  { %1003 = vrot.lane.b32.xlu1 %v2174_v13, %s1516_s8 }
 0x699   :  { %1007 = vrot.lane.b32.xlu1 %v2186_v14, %s1516_s8 }
 0x69d   :  { %1009 = vrot.lane.b32.xlu1 %v2178_v25, %s1516_s8 }
 0x6a1   :  { %1031 = vrot.lane.b32.xlu1 %v2174_v13, %s1518_s10 }
 0x6a5   :  { %1035 = vrot.lane.b32.xlu1 %v2186_v14, %s1518_s10 }
 0x6a9   :  { %1037 = vrot.lane.b32.xlu1 %v2178_v25, %s1518_s10 }
 0x6ad   :  { %1059 = vrot.lane.b32.xlu1 %v2174_v13, %s1517_s9 }
 0x6b1   :  { %1063 = vrot.lane.b32.xlu1 %v2186_v14, %s1517_s9 }
 0x6b5   :  { %1087 = vrot.lane.b32.xlu1 %v2174_v13, %s1520_s11 }
 0x6b9   :  { %1091 = vrot.lane.b32.xlu1 %v2186_v14, %s1520_s11 }
 0x6db   :  { %v898_v32 = vpop.permute.xlu0 %897  ;;  %v892_v40 = vpop.permute.xlu1 %891 }
 0x6dc   :  { %v902_v8 = vsel %vm61_vm2, %v898_v32, %v892_v40 }
 0x6dd   :  { %v903_v54 = vmul.f32 %v902_v8, %v1728_v43  ;;  %v889_v43 = vmul.f32 %v2172_v5, %v2186_v14 }
 0x6df   :  { %v896_v48 = vpop.permute.xlu0 %895  ;;  %v911_v60 = vmul.f32 %v909_v52, %v903_v54  ;;  %v894_v56 = vpop.permute.xlu1 %893 }
 0x6e0   :  { %v901_v20 = vsel %vm61_vm2, %v892_v40, %v894_v56  ;;  %v900_v26 = vsel %vm61_vm2, %v894_v56, %v896_v48 }
 0x6e1   :  { %v915_v3 = vadd.f32 %v911_v60, %v887_v2  ;;  %v904_v53 = vmul.f32 %v901_v20, %v1695_v24  ;;  %v905_v46 = vmul.f32 %v900_v26, %v1798_v37  ;;  %v899_v37 = vsel %vm61_vm2, %v896_v48, %v898_v32 }
 0x6e3   :  { %v912_v8 = vmul.f32 %v909_v52, %v904_v53  ;;  %v913_v4 = vmul.f32 %v909_v52, %v905_v46  ;;  %v920_v1 = vpop.permute.xlu1 %919  ;;  %v922_v23 = vpop.permute.xlu0 %921  ;;  %v906_v53 = vmul.f32 %v899_v37, %v1802_v39  ;;  %v890_v39 = vmul.f32 %v2172_v5, %v2178_v25 }
 0x6e4   :  { %v929_v40 = vsel %vm99_vm1, %v920_v1, %v922_v23 }
 0x6e5   :  { %v916_v54 = vadd.f32 %v912_v8, %v888_v28  ;;  %v917_v13 = vadd.f32 %v913_v4, %v889_v43  ;;  %v932_v56 = vmul.f32 %v929_v40, %v1678_v19 }
 0x6e7   :  { %v926_v50 = vpop.permute.xlu1 %925  ;;  %v940_v60 = vmul.f32 %v937_v33, %v932_v56  ;;  %v950_v20 = vpop.permute.xlu0 %949  ;;  %v914_v56 = vmul.f32 %v909_v52, %v906_v53 }
 0x6e8   :  { %v930_v24 = vsel %vm99_vm1, %v926_v50, %v920_v1 }
 0x6e9   :  { %v931_v46 = vmul.f32 %v930_v24, %v1719_v38  ;;  %v944_v43 = vadd.f32 %v940_v60, %v916_v54 }
 0x6eb   :  { %v924_v2 = vpop.permute.xlu1 %923  ;;  %v939_v32 = vmul.f32 %v937_v33, %v931_v46  ;;  %v918_v46 = vadd.f32 %v914_v56, %v890_v39 }
 0x6ec   :  { %v927_v4 = vsel %vm99_vm1, %v924_v2, %v926_v50  ;;  %v928_v28 = vsel %vm99_vm1, %v922_v23, %v924_v2 }
 0x6ed   :  { %v933_v48 = vmul.f32 %v928_v28, %v1749_v61  ;;  %v934_v38 = vmul.f32 %v927_v4, %v1752_v62  ;;  %v943_v24 = vadd.f32 %v939_v32, %v915_v3 }
 0x6ef   :  { %v948_v26 = vpop.permute.xlu1 %947  ;;  %v942_v54 = vmul.f32 %v937_v33, %v934_v38 }
 0x6f0   :  { %v957_v19 = vsel %vm137_vm3, %v948_v26, %v950_v20 }
 0x6f1   :  { %v960_v1 = vmul.f32 %v957_v19, %v1707_v30  ;;  %v941_v30 = vmul.f32 %v937_v33, %v933_v48  ;;  %v946_v28 = vadd.f32 %v942_v54, %v918_v46 }
 0x6f3   :  { %v968_v8 = vmul.f32 %v965_v27, %v960_v1  ;;  %v954_v40 = vpop.permute.xlu1 %953  ;;  %v945_v4 = vadd.f32 %v941_v30, %v917_v13 }
 0x6f4   :  { %v958_v50 = vsel %vm137_vm3, %v954_v40, %v948_v26 }
 0x6f5   :  { %v972_v23 = vadd.f32 %v968_v8, %v944_v43  ;;  %v959_v2 = vmul.f32 %v958_v50, %v1738_v51  ;;  %v978_v43 = vpop.permute.xlu0 %977 }
 0x6f7   :  { %v967_v37 = vmul.f32 %v965_v27, %v959_v2  ;;  %v952_v60 = vpop.permute.xlu1 %951 }
 0x6f8   :  { %v955_v61 = vsel %vm137_vm3, %v952_v60, %v954_v40  ;;  %v956_v62 = vsel %vm137_vm3, %v950_v20, %v952_v60 }
 0x6f9   :  { %v971_v26 = vadd.f32 %v967_v37, %v943_v24  ;;  %v961_v52 = vmul.f32 %v956_v62, %v1790_v35  ;;  %v962_v51 = vmul.f32 %v955_v61, %v1794_v36  ;;  %v1006_v38 = vpop.permute.xlu0 %1005 }
 0x6fb   :  { %v969_v5 = vmul.f32 %v965_v27, %v961_v52  ;;  %v970_v3 = vmul.f32 %v965_v27, %v962_v51  ;;  %v976_v19 = vpop.permute.xlu1 %975 }
 0x6fc   :  { %v985_v35 = vsel %vm175_vm0, %v976_v19, %v978_v43 }
 0x6fd   :  { %v973_v33 = vadd.f32 %v969_v5, %v945_v4  ;;  %v974_v53 = vadd.f32 %v970_v3, %v946_v28  ;;  %v1034_v20 = vpop.permute.xlu0 %1033  ;;  %v988_v27 = vmul.f32 %v985_v35, %v1675_v18 }
 0x6ff   :  { %v982_v1 = vpop.permute.xlu1 %981  ;;  %v996_v61 = vmul.f32 %v2248_v16, %v988_v27 }
 0x700   :  { %v986_v36 = vsel %vm175_vm0, %v982_v1, %v976_v19 }
 0x701   :  { %v1062_v56 = vpop.permute.xlu0 %1061  ;;  %v987_v39 = vmul.f32 %v986_v36, %v1713_v34 }
 0x703   :  { %v980_v32 = vpop.permute.xlu1 %979  ;;  %v995_v62 = vmul.f32 %v2248_v16, %v987_v39 }
 0x704   :  { %v984_v2 = vsel %vm175_vm0, %v978_v43, %v980_v32  ;;  %v983_v30 = vsel %vm175_vm0, %v980_v32, %v982_v1  ;;  %v1000_v1 = vadd.f32 %v996_v61, %v972_v23 }
 0x705   :  { %v1066_v24 = vpop.permute.xlu0 %1065  ;;  %v989_v37 = vmul.f32 %v984_v2, %v1755_v63  ;;  %v990_v18 = vmul.f32 %v983_v30, %v1760_v6  ;;  %v999_v43 = vadd.f32 %v995_v62, %v971_v26 }
 0x707   :  { %v1004_v48 = vpop.permute.xlu1 %1003  ;;  %v997_v63 = vmul.f32 %v2248_v16, %v989_v37  ;;  %v998_v32 = vmul.f32 %v2248_v16, %v990_v18 }
 0x708   :  { %v1013_v60 = vsel %vm213_vm5, %v1004_v48, %v1006_v38 }
 0x709   :  { %v1015_v52 = vmul.f32 %v1013_v60, %v1848_v31  ;;  %v1090_v5 = vpop.permute.xlu0 %1089  ;;  %v1001_v35 = vadd.f32 %v997_v63, %v973_v33  ;;  %v1002_v27 = vadd.f32 %v998_v32, %v974_v53 }
 0x70b   :  { %v1008_v8 = vpop.permute.xlu1 %1007 }
 0x70c   :  { %v1012_v46 = vsel %vm213_vm5, %v1006_v38, %v1008_v8  ;;  %v1023_v38 = vmul.f32 %v2250_v45, %v1015_v52 }
 0x70d   :  { %v1016_v6 = vmul.f32 %v1012_v46, %v1805_v41  ;;  %v1094_v2 = vpop.permute.xlu0 %1093 }
 0x70e   :  { %v1027_v39 = vadd.f32 %v1023_v38, %v999_v43 }
 0x70f   :  { %v1010_v40 = vpop.permute.xlu1 %1009  ;;  %v1024_v36 = vmul.f32 %v2250_v45, %v1016_v6 }
 0x710   :  { %v1011_v34 = vsel %vm213_vm5, %v1008_v8, %v1010_v40  ;;  %v1014_v4 = vsel %vm213_vm5, %v1010_v40, %v1004_v48 }
 0x711   :  { %v1017_v3 = vmul.f32 %v1011_v34, %v1863_v49  ;;  %v1018_v8 = vmul.f32 %v1014_v4, %v1868_v55 }
 0x713   :  { %v1032_v50 = vpop.permute.xlu1 %1031  ;;  %v1025_v55 = vmul.f32 %v2250_v45, %v1017_v3  ;;  %v1026_v33 = vmul.f32 %v2250_v45, %v1018_v8 }
 0x714   :  { %v1041_v28 = vsel %vm251_vm7, %v1032_v50, %v1034_v20 }
 0x715   :  { %v1043_v41 = vmul.f32 %v1041_v28, %v1860_v17  ;;  %v1029_v37 = vadd.f32 %v1025_v55, %v1001_v35  ;;  %v1030_v18 = vadd.f32 %v1026_v33, %v1002_v27 }
 0x717   :  { %v1036_v13 = vpop.permute.xlu1 %1035 }
 0x718   :  { %v1040_v19 = vsel %vm251_vm7, %v1034_v20, %v1036_v13 }
 0x719   :  { %v1044_v40 = vmul.f32 %v1040_v19, %v1852_v22 }
 0x71b   :  { %v1038_v54 = vpop.permute.xlu1 %1037 }
 0x71c   :  { %v1039_v31 = vsel %vm251_vm7, %v1036_v13, %v1038_v54  ;;  %v1042_v49 = vsel %vm251_vm7, %v1038_v54, %v1032_v50  ;;  %v1052_v54 = vmul.f32 %v2252_v10, %v1044_v40 }
 0x71d   :  { %v1045_v23 = vmul.f32 %v1039_v31, %v1895_v29  ;;  %v1046_v50 = vmul.f32 %v1042_v49, %v1898_v7 }
 0x71f   :  { %v1060_v51 = vpop.permute.xlu1 %1059  ;;  %v1054_v60 = vmul.f32 %v2252_v10, %v1046_v50 }
 0x720   :  { %v1069_v48 = vsel %vm289_vm6, %v1060_v51, %v1062_v56  ;;  %v1070_v22 = vsel %vm289_vm6, %v1066_v24, %v1060_v51 }
 0x721   :  { %v1071_v17 = vmul.f32 %v1069_v48, %v1835_v44  ;;  %v1053_v44 = vmul.f32 %v2252_v10, %v1045_v23  ;;  %v1058_v19 = vadd.f32 %v1054_v60, %v1030_v18 }
 0x723   :  { %v1064_v20 = vpop.permute.xlu1 %1063  ;;  %v1079_v53 = vmul.f32 %v2254_v12, %v1071_v17 }
 0x724   :  { %v1067_v16 = vsel %vm289_vm6, %v1064_v20, %v1066_v24  ;;  %v1068_v26 = vsel %vm289_vm6, %v1062_v56, %v1064_v20  ;;  %v1051_v56 = vmul.f32 %v2252_v10, %v1043_v41  ;;  %v1028_v24 = vadd.f32 %v1024_v36, %v1000_v1 }
 0x725   :  { %v1072_v29 = vmul.f32 %v1068_v26, %v1810_v42  ;;  %v1073_v13 = vmul.f32 %v1067_v16, %v1872_v57  ;;  %v1074_v57 = vmul.f32 %v1070_v22, %v1879_v21  ;;  %v1057_v21 = vadd.f32 %v1053_v44, %v1029_v37 }
 0x726   :  { %v1055_v46 = vadd.f32 %v1051_v56, %v1027_v39  ;;  %v1056_v63 = vadd.f32 %v1052_v54, %v1028_v24  ;;  %v1165_v39 = vld [vmem:[%s2433_s5] sm:$0xf]  ;;  %v2444_v56 = vmov 5   ;;  %v2445_v44 = vmov 6  }
 0x727   :  { %v1088_v30 = vpop.permute.xlu1 %1087  ;;  %v1080_v61 = vmul.f32 %v2254_v12, %v1072_v29  ;;  %v1081_v62 = vmul.f32 %v2254_v12, %v1073_v13  ;;  %v1082_v10 = vmul.f32 %v2254_v12, %v1074_v57  ;;  %v1447_v33 = vcombine.low %v1165_v39, %v1165_v39  ;;  %v2389_v54 = vld [vmem:[%s2430_s6] sm:$0xff] }
 0x728   :  { %v1097_v7 = vsel %vm327_vm8, %v1088_v30, %v1090_v5  ;;  %v1098_v42 = vsel %vm327_vm8, %v1094_v2, %v1088_v30  ;;  %v1083_v28 = vadd.f32 %v1079_v53, %v1055_v46 }
 0x729   :  { %v1099_v45 = vmul.f32 %v1097_v7, %v1903_v47  ;;  %v1102_v34 = vmul.f32 %v1098_v42, %v1919_v15  ;;  %v1084_v15 = vadd.f32 %v1080_v61, %v1056_v63  ;;  %v1085_v31 = vadd.f32 %v1081_v62, %v1057_v21 }
 0x72a   :  { %v1086_v38 = vadd.f32 %v1082_v10, %v1058_v19  ;;  %v2447_v19 = vld [vmem:[#allocation2_spill] sm:$0xff] }
 0x72b   :  { %v1107_v52 = vmul.f32 %v2256_v59, %v1099_v45  ;;  %v1092_v51 = vpop.permute.xlu1 %1091  ;;  %v1110_v1 = vmul.f32 %v2256_v59, %v1102_v34 }
 0x72c   :  { %v1095_v4 = vsel %vm327_vm8, %v1092_v51, %v1094_v2  ;;  %v1096_v47 = vsel %vm327_vm8, %v1090_v5, %v1092_v51 }
 0x72d   :  { %v1100_v6 = vmul.f32 %v1096_v47, %v1926_v11  ;;  %v1101_v3 = vmul.f32 %v1095_v4, %v1929_v0  ;;  %v1111_v43 = vadd.f32 %v1107_v52, %v1083_v28  ;;  %v1114_v8 = vadd.f32 %v1110_v1, %v1086_v38  ;;  %v2446_v47 = vld [vmem:[#allocation3_spill] sm:$0xff] }
 0x72e   :  { %v1167_v10 = vpack.c.bf16 %v2446_v47, %v2446_v47  ;;  %v1169_v28 = vpack.c.bf16 %v2178_v25, %v2178_v25 }
 0x72f   :  { %v1108_v32 = vmul.f32 %v2256_v59, %v1100_v6  ;;  %v1109_v48 = vmul.f32 %v2256_v59, %v1101_v3  ;;  %v1120_v41 = vmul.f32 %v1111_v43, %v1111_v43  ;;  %v1123_v23 = vmul.f32 %v1114_v8, %v1114_v8 }
 0x731   :  { %v1112_v9 = vadd.f32 %v1108_v32, %v1084_v15  ;;  %v1113_v5 = vadd.f32 %v1109_v48, %v1085_v31  ;;  %v1166_v15 = vpack.c.bf16 %v2447_v19, %v2447_v19  ;;  %v1168_v31 = vpack.c.bf16 %v2186_v14, %v2186_v14 }
 0x732   :  { %v2448_v32 = vmov 0  }
 0x733   :  { %v1115_v12 = vadd.f32 %v1112_v9, %v1111_v43  ;;  %v1121_v49 = vmul.f32 %v1112_v9, %v1112_v9  ;;  %v1122_v20 = vmul.f32 %v1113_v5, %v1113_v5  ;;  %v1281_v25 = vsel %vm405_vm4, %v1166_v15, 0 }
 0x735   :  { %v1116_v11 = vadd.f32 %v1115_v12, %v1113_v5  ;;  %v1124_v0 = vadd.f32 %v1121_v49, %v1120_v41 }
 0x737   :  { %v1117_v40 = vadd.f32 %v1116_v11, %v1114_v8  ;;  %v1125_v16 = vadd.f32 %v1124_v0, %v1122_v20 }
 0x739   :  { %1118 = vadd.xlane.f32.xlu1 %v1117_v40  ;;  %v1126_v26 = vadd.f32 %v1125_v16, %v1123_v23 }
 0x73b   :  { %1127 = vadd.xlane.f32.xlu0 %v1126_v26 }
 0x7c6   :  { %v1119_v35 = vpop.xlane.xlu1 %1118 }
 0x7c7   :  { %v1129_v36 = vmul.f32 0.001953125, %v1119_v35 }
 0x7c8   :  { %v1128_v55 = vpop.xlane.xlu0 %1127 }
 0x7c9   :  { %v1131_v59 = vmul.f32 %v1129_v36, %v1129_v36  ;;  %v1130_v17 = vmul.f32 0.001953125, %v1128_v55 }
 0x7cb   :  { %v1132_v50 = vsub.f32 %v1130_v17, %v1131_v59 }
 0x7cd   :  { %v1133_v22 = vmax.f32 %v1132_v50, 0.0 }
 0x7cf   :  { %v1134_v29 = vadd.f32 1e-05, %v1133_v22 }
 0x7d1   :  { %1507 = vrsqrt.f32 %v1134_v29 }
 0x7db   :  { %v1508_v13 = vpop.eup %1507 }
 0x7dc   :  { %v1136_v27 = vmul.f32 %v1508_v13, %v1956_v58 }
 0x7de   :  { %1145 = vperm.xlu1 %1495, %v1136_v27   ;;  %v1137_v2 = vmul.f32 %v1136_v27, %v1129_v36 }
 0x7e0   :  { %1139 = vrot.lane.b32.xlu0 %v1137_v2, %s1512_s26 }
 0x7e2   :  { %1496 = vset.pattern.permute.xlu1 %v2444_v56  ;;  %v2449_v56 = vmov 7  }
 0x7e4   :  { %1177 = vrot.lane.b32.xlu0 %v1447_v33, %s1529_s30 }
 0x852   :  { %v1140_v30 = vpop.permute.xlu0 %1139 }
 0x853   :  { %v1142_v58 = vsub.f32 %v2389_v54, %v1140_v30 }
 0x855   :  { %1154 = vperm.xlu1 %1496, %v1142_v58  }
 0x856   :  { %v1178_v1 = vpop.permute.xlu0 %1177 }
 0x859   :  { %1497 = vset.pattern.permute.xlu1 %v2445_v44 }
 0x85d   :  { %v1146_v7 = vpop.permute.xlu1 %1145 }
 0x85e   :  { %v1148_v42 = vmul.f32 %v1146_v7, %v1111_v43  ;;  %v1149_v24 = vmul.f32 %v1146_v7, %v1112_v9  ;;  %v1150_v57 = vmul.f32 %v1146_v7, %v1113_v5  ;;  %v1151_v53 = vmul.f32 %v1146_v7, %v1114_v8 }
 0x85f   :  { %v1287_v43 = vsel %vm405_vm4, %v1168_v31, 0 }
 0x8d4   :  { %v1155_v45 = vpop.permute.xlu1 %1154 }
 0x8d5   :  { %v1157_v37 = vadd.f32 %v1155_v45, %v1148_v42  ;;  %v1158_v60 = vadd.f32 %v1155_v45, %v1149_v24  ;;  %v1159_v61 = vadd.f32 %v1155_v45, %v1150_v57  ;;  %v1160_v62 = vadd.f32 %v1155_v45, %v1151_v53 }
 0x8d7   :  { %v1162_v18 = vmax.f32 %v1158_v60, 0.0  ;;  %v1164_v46 = vmax.f32 %v1160_v62, 0.0  ;;  %v1161_v34 = vmax.f32 %v1157_v37, 0.0  ;;  %v1163_v52 = vmax.f32 %v1159_v61, 0.0 }
 0x8d9   :  { %v1171_v51 = vpack.c.bf16 %v1162_v18, %v1162_v18  ;;  %v1173_v63 = vpack.c.bf16 %v1164_v46, %v1164_v46  ;;  %v1170_v21 = vpack.c.bf16 %v1161_v34, %v1161_v34  ;;  %v1172_v4 = vpack.c.bf16 %v1163_v52, %v1163_v52 }
 0x8db   :  { %1448 = vmatprep.subr.msk.bf16.mxu0 %vm405_vm4, %v1171_v51  ;;  %1450 = vmatprep.subr.msk.bf16.mxu1 %vm405_vm4, %v1173_v63  ;;  %v1184_v6 = vsel %vm405_vm4, %v1170_v21, 0  ;;  %v1190_v3 = vsel %vm405_vm4, %v1172_v4, 0 }
 0x8dc   :  { %1196 = vmatpush1.bf16.msra.mxu0 %v1184_v6  ;;  %1237 = vmatpush1.bf16.msra.mxu1 %v1190_v3 }
 0x8dd   :  { %1452 = vmatprep.subr.msk.bf16.mxu0 %vm405_vm4, %v1167_v10  ;;  %1454 = vmatprep.subr.msk.bf16.mxu1 %vm405_vm4, %v1169_v28 }
 0x8df   :  { %1449 = vmatmul.mubr.msk.bf16.vlgmr.msra.gmra.mrb[8].mxu0 %vm1179_vm12, %v1178_v1  ;;  %1451 = vmatmul.mubr.msk.bf16.vlgmr.msra.gmra.mrb[8].mxu1 %vm1179_vm12, %v1178_v1 }
 0x8e0   :  { %1293 = vmatpush1.bf16.msra.mxu0 %v1281_v25  ;;  %1334 = vmatpush1.bf16.msra.mxu1 %v1287_v43 }
 0x8e1   :  { %1324 = vmatprep.mubr.bf16.mxu0 %v2448_v32  ;;  %1365 = vmatprep.mubr.bf16.mxu1 %v2448_v32 }
 0x8eb   :  { %1453 = vmatmul.mubr.msk.bf16.vlgmr.msra.gmra.mrb[8].mxu0 %vm1179_vm12, %v1165_v39  ;;  %1455 = vmatmul.mubr.msk.bf16.vlgmr.msra.gmra.mrb[8].mxu1 %vm1179_vm12, %v1165_v39 }
 0x9be   :  { %v1326_v14 = vpop.f32.mrb[8].mxu0  ;;  %v1367_v48 = vpop.f32.mrb[8].mxu1 }
 0x9bf   :  { %v1379_v38 = vmul.f32 %v1326_v14, %v1326_v14  ;;  %v1328_v9 = vpop.f32.mrb[9].mxu0  ;;  %v1369_v5 = vpop.f32.mrb[9].mxu1  ;;  %v1381_v0 = vmul.f32 %v1367_v48, %v1367_v48 }
 0x9c0   :  { %v1374_v8 = vadd.f32 %v1328_v9, %v1326_v14  ;;  %v1380_v12 = vmul.f32 %v1328_v9, %v1328_v9  ;;  %v1330_v41 = vpop.f32.mrb[10].mxu0  ;;  %v1371_v49 = vpop.f32.mrb[10].mxu1  ;;  %v1382_v26 = vmul.f32 %v1369_v5, %v1369_v5 }
 0x9c1   :  { %v1331_v11 = vpop.f32.mrb[11].mxu0  ;;  %v1372_v20 = vpop.f32.mrb[11].mxu1 }
 0x9c2   :  { %v1383_v40 = vadd.f32 %v1380_v12, %v1379_v38  ;;  %v1375_v23 = vadd.f32 %v1374_v8, %v1367_v48 }
 0x9c4   :  { %v1376_v16 = vadd.f32 %v1375_v23, %v1369_v5  ;;  %v1384_v35 = vadd.f32 %v1383_v40, %v1381_v0 }
 0x9c6   :  { %1377 = vadd.xlane.f32.xlu1 %v1376_v16  ;;  %v1385_v36 = vadd.f32 %v1384_v35, %v1382_v26 }
 0x9c8   :  { %1386 = vadd.xlane.f32.xlu0 %v1385_v36 }
 0xa53   :  { %v1378_v55 = vpop.xlane.xlu1 %1377 }
 0xa54   :  { %v1388_v59 = vmul.f32 0.001953125, %v1378_v55 }
 0xa55   :  { %v1387_v17 = vpop.xlane.xlu0 %1386 }
 0xa56   :  { %v1390_v50 = vmul.f32 %v1388_v59, %v1388_v59  ;;  %v1389_v22 = vmul.f32 0.001953125, %v1387_v17 }
 0xa58   :  { %v1391_v29 = vsub.f32 %v1389_v22, %v1390_v50 }
 0xa5a   :  { %v1392_v13 = vmax.f32 %v1391_v29, 0.0 }
 0xa5c   :  { %v1393_v27 = vadd.f32 1e-05, %v1392_v13 }
 0xa5e   :  { %1509 = vrsqrt.f32 %v1393_v27 }
 0xa68   :  { %v1510_v2 = vpop.eup %1509 }
 0xa69   :  { %v1395_v39 = vmul.f32 %v2389_v54, %v1510_v2 }
 0xa6b   :  { %1404 = vperm.xlu1 %1497, %v1395_v39   ;;  %v1396_v33 = vmul.f32 %v1395_v39, %v1388_v59 }
 0xa6d   :  { %1398 = vrot.lane.b32.xlu0 %v1396_v33, %s1512_s26 }
 0xa6f   :  { %1498 = vset.pattern.permute.xlu1 %v2449_v56 }
 0xadf   :  { %v1399_v30 = vpop.permute.xlu0 %1398 }
 0xae0   :  { %v1401_v58 = vsub.f32 %v2389_v54, %v1399_v30 }
 0xae2   :  { %1413 = vperm.xlu1 %1498, %v1401_v58  }
 0xaea   :  { %v1405_v44 = vpop.permute.xlu1 %1404 }
 0xaeb   :  { %v1407_v7 = vmul.f32 %v1405_v44, %v1326_v14  ;;  %v1408_v42 = vmul.f32 %v1405_v44, %v1328_v9  ;;  %v1409_v24 = vmul.f32 %v1405_v44, %v1367_v48  ;;  %v1410_v57 = vmul.f32 %v1405_v44, %v1369_v5 }
 0xb61   :  { %v1414_v53 = vpop.permute.xlu1 %1413 }
 0xb62   :  { %v1416_v45 = vadd.f32 %v1414_v53, %v1407_v7  ;;  %v1417_v37 = vadd.f32 %v1414_v53, %v1408_v42  ;;  %v1418_v60 = vadd.f32 %v1414_v53, %v1409_v24  ;;  %v1419_v61 = vadd.f32 %v1414_v53, %v1410_v57 }
 0xb64   :  { %v1420_v62 = vmax.f32 %v1416_v45, 0.0  ;;  %v1421_v18 = vmax.f32 %v1417_v37, 0.0  ;;  %v1422_v46 = vmax.f32 %v1418_v60, 0.0  ;;  %v1423_v34 = vmax.f32 %v1419_v61, 0.0 }
 0xb66   :  { %1424 = vst [vmem:[%s2434_s7] sm:$0xff] %v1420_v62  ;;  %1425 = vst [vmem:[%s2434_s7 + $0x8] sm:$0xff] %v1421_v18 }
 0xb67   :  { %1426 = vst [vmem:[%s2434_s7 + $0x10] sm:$0xff] %v1422_v46  ;;  %1427 = vst [vmem:[%s2434_s7 + $0x18] sm:$0xff] %v1423_v34 }

</bundles_post_ra>
